<compile_context>
chip_gen: v7x
topology: tpu7x:2x2x1
jax: 0.10.0
libtpu: 0.0.40
codegen_flags: <defaults>
</compile_context>

<pallas_src>
import math
import functools

import jax
import jax.numpy as jnp
from jax.experimental import pallas as pl
from jax.experimental.pallas import tpu as pltpu


# ---------------------------------------------------------------------------
# In-kernel helpers (f32 math)
# ---------------------------------------------------------------------------
def _bert_layernorm(x, g, b, eps=1e-6):
    """BERT-pytorch LayerNorm: unbiased std, divide by (std + eps)."""
    n = x.shape[-1]
    mean = jnp.mean(x, axis=-1, keepdims=True)
    diff = x - mean
    var_unbiased = jnp.sum(diff * diff, axis=-1, keepdims=True) / (n - 1)
    std = jnp.sqrt(var_unbiased)
    return g * diff / (std + eps) + b


def _gelu_tanh(x):
    """BERT-pytorch GELU (tanh approximation)."""
    return 0.5 * x * (1.0 + jnp.tanh(math.sqrt(2.0 / math.pi) * (x + 0.044715 * x * x * x)))


# ---------------------------------------------------------------------------
# Pallas kernel: one full transformer block for ONE batch item ([S, H] slab)
# ---------------------------------------------------------------------------
def transformer_block_kernel(
    x_ref, bias_ref,
    ln1g_ref, ln1b_ref,
    wq_ref, bq_ref, wk_ref, bk_ref, wv_ref, bv_ref,
    wo_ref, bo_ref,
    ln2g_ref, ln2b_ref,
    w1_ref, b1_ref, w2_ref, b2_ref,
    out_ref,
    *, n_heads,
):
    x = x_ref[...]                                  # [S, H] f32
    S, H = x.shape
    dh = H // n_heads
    scale = jnp.float32(1.0 / math.sqrt(dh))

    # ----- sublayer 1: multi-head self-attention (pre-LN) -----
    h1 = _bert_layernorm(x, ln1g_ref[...], ln1b_ref[...])
    h1b = h1.astype(jnp.bfloat16)

    # 2-D projections: bf16 inputs, f32 accumulation on the MXU.
    q = jnp.dot(h1b, wq_ref[...], preferred_element_type=jnp.float32) + bq_ref[...]
    k = jnp.dot(h1b, wk_ref[...], preferred_element_type=jnp.float32) + bk_ref[...]
    v = jnp.dot(h1b, wv_ref[...], preferred_element_type=jnp.float32) + bv_ref[...]
    q = q * scale                                   # scale once, before the head split

    # One up-front head-major relayout instead of per-head lane slicing.
    qh = jnp.transpose(q.reshape(S, n_heads, dh), (1, 0, 2)).astype(jnp.bfloat16)  # [nh,S,dh]
    kh = jnp.transpose(k.reshape(S, n_heads, dh), (1, 0, 2)).astype(jnp.bfloat16)
    vh = jnp.transpose(v.reshape(S, n_heads, dh), (1, 0, 2)).astype(jnp.bfloat16)

    scores = jnp.einsum('hqd,hkd->hqk', qh, kh,
                        preferred_element_type=jnp.float32)        # [nh, S, S] f32
    scores = scores + bias_ref[...][None, :, :]                    # additive mask bias
    scores = scores - jnp.max(scores, axis=-1, keepdims=True)
    p = jnp.exp(scores)
    p = p * pl.reciprocal(jnp.sum(p, axis=-1, keepdims=True), approx=True)

    ctx = jnp.einsum('hqk,hkd->hqd', p.astype(jnp.bfloat16), vh,
                     preferred_element_type=jnp.float32)           # [nh, S, dh] f32
    ctx = jnp.transpose(ctx, (1, 0, 2)).reshape(S, H)              # concat heads -> [S, H]

    # Single [S,H] @ [H,H] output projection (no per-head Wo accumulation).
    attn = jnp.dot(ctx.astype(jnp.bfloat16), wo_ref[...],
                   preferred_element_type=jnp.float32) + bo_ref[...]
    x2 = x + attn                                   # residual (dropout is eval no-op)

    # ----- sublayer 2: position-wise feed-forward (pre-LN) -----
    h2 = _bert_layernorm(x2, ln2g_ref[...], ln2b_ref[...])
    ff = jnp.dot(h2.astype(jnp.bfloat16), w1_ref[...],
                 preferred_element_type=jnp.float32) + b1_ref[...]
    ff = _gelu_tanh(ff)                             # f32 GELU on the per-item tile only
    ff = jnp.dot(ff.astype(jnp.bfloat16), w2_ref[...],
                 preferred_element_type=jnp.float32) + b2_ref[...]

    out_ref[...] = x2 + ff                          # final block dropout is eval no-op


def transformer_block(x, bias, p, n_heads):
    B, S, H = x.shape
    F = p['w1'].shape[1]

    def act_map(b):        # per-batch-item activation block
        return (b, 0, 0)

    def const_map(b):      # weights: same block for every grid step -> stays VMEM-resident
        return (0, 0)

    in_specs = [
        pl.BlockSpec((None, S, H), act_map),                      # x       -> [S, H]
        pl.BlockSpec((None, 1, S), act_map),                      # mask bias -> [1, S]
        pl.BlockSpec((1, H), const_map), pl.BlockSpec((1, H), const_map),   # ln1 g,b
        pl.BlockSpec((H, H), const_map), pl.BlockSpec((1, H), const_map),   # wq, bq
        pl.BlockSpec((H, H), const_map), pl.BlockSpec((1, H), const_map),   # wk, bk
        pl.BlockSpec((H, H), const_map), pl.BlockSpec((1, H), const_map),   # wv, bv
        pl.BlockSpec((H, H), const_map), pl.BlockSpec((1, H), const_map),   # wo, bo
        pl.BlockSpec((1, H), const_map), pl.BlockSpec((1, H), const_map),   # ln2 g,b
        pl.BlockSpec((H, F), const_map), pl.BlockSpec((1, F), const_map),   # w1, b1
        pl.BlockSpec((F, H), const_map), pl.BlockSpec((1, H), const_map),   # w2, b2
    ]
    out_spec = pl.BlockSpec((None, S, H), act_map)

    return pl.pallas_call(
        functools.partial(transformer_block_kernel, n_heads=n_heads),
        out_shape=jax.ShapeDtypeStruct((B, S, H), jnp.float32),
        grid=(B,),
        in_specs=in_specs,
        out_specs=out_spec,
        compiler_params=pltpu.CompilerParams(
            dimension_semantics=("parallel",),      # megacore sharding on v7x
            vmem_limit_bytes=48 * 1024 * 1024,      # above 16/32 MiB defaults, < v7x physical
        ),
    )(x, bias,
      p['ln1_g'], p['ln1_b'],
      p['wq'], p['bq'], p['wk'], p['bk'], p['wv'], p['bv'],
      p['wo'], p['bo'],
      p['ln2_g'], p['ln2_b'],
      p['w1'], p['b1'], p['w2'], p['b2'])


# ---------------------------------------------------------------------------
# Glue: embeddings + layer stack (eval-mode BERT forward)
# ---------------------------------------------------------------------------
@functools.lru_cache(maxsize=None)
def sinusoidal_pe(seq_len, d_model):
    position = jnp.arange(seq_len, dtype=jnp.float32)[:, None]
    div_term = jnp.exp(jnp.arange(0, d_model, 2, dtype=jnp.float32)
                       * -(math.log(10000.0) / d_model))
    pe = jnp.zeros((seq_len, d_model), jnp.float32)
    pe = pe.at[:, 0::2].set(jnp.sin(position * div_term))
    pe = pe.at[:, 1::2].set(jnp.cos(position * div_term))
    return pe


def bert_forward(tokens, segments, mask, params, n_heads):
    B, S = tokens.shape
    H = params['tok_emb'].shape[1]
    # BERTEmbedding: token + position (sinusoidal) + segment; dropout is eval no-op.
    x = (params['tok_emb'][tokens]
         + params['seg_emb'][segments]
         + sinusoidal_pe(S, H)[None, :, :]).astype(jnp.float32)
    # Additive attention bias shared by all layers: 0 for valid keys, -1e9 for padded keys
    # (matches the reference masked_fill(-1e9) semantics after softmax).
    bias = ((mask.astype(jnp.float32) - 1.0) * 1e9)[:, None, :]    # [B, 1, S]
    for layer_params in params['layers']:
        x = transformer_block(x, bias, layer_params, n_heads)
    return x


# ---------------------------------------------------------------------------
# Deterministic parameter construction (shapes from the module __init__)
# ---------------------------------------------------------------------------
def init_params(key, vocab_size, hidden, n_layers):
    def nrm(k, shape, scale=0.02, dtype=jnp.float32):
        return (scale * jax.random.normal(k, shape)).astype(dtype)

    keys = jax.random.split(key, 2 + n_layers)
    tok_emb = nrm(keys[0], (vocab_size, hidden)).at[0].set(0.0)   # padding_idx=0
    seg_emb = nrm(keys[1], (3, hidden)).at[0].set(0.0)            # padding_idx=0

    bf16 = jnp.bfloat16   # matmul weights in bf16 (f32 accumulation in-kernel)
    layers = []
    for li in range(n_layers):
        lk = jax.random.split(keys[2 + li], 6)
        layers.append(dict(
            ln1_g=jnp.ones((1, hidden), jnp.float32),
            ln1_b=jnp.zeros((1, hidden), jnp.float32),
            wq=nrm(lk[0], (hidden, hidden), dtype=bf16), bq=jnp.zeros((1, hidden), jnp.float32),
            wk=nrm(lk[1], (hidden, hidden), dtype=bf16), bk=jnp.zeros((1, hidden), jnp.float32),
            wv=nrm(lk[2], (hidden, hidden), dtype=bf16), bv=jnp.zeros((1, hidden), jnp.float32),
            wo=nrm(lk[3], (hidden, hidden), dtype=bf16), bo=jnp.zeros((1, hidden), jnp.float32),
            ln2_g=jnp.ones((1, hidden), jnp.float32),
            ln2_b=jnp.zeros((1, hidden), jnp.float32),
            w1=nrm(lk[4], (hidden, 4 * hidden), dtype=bf16),
            b1=jnp.zeros((1, 4 * hidden), jnp.float32),
            w2=nrm(lk[5], (4 * hidden, hidden), dtype=bf16),
            b2=jnp.zeros((1, hidden), jnp.float32),
        ))
    return dict(tok_emb=tok_emb, seg_emb=seg_emb, layers=layers)


# ---------------------------------------------------------------------------
if __name__ == "__main__":
    # Small shapes consistent with the module (hidden, heads, layers scaled down).
    B, S, H, N_HEADS, N_LAYERS, VOCAB = 2, 8, 32, 4, 2, 100

    key = jax.random.PRNGKey(0)
    k_tok, k_seg, k_par = jax.random.split(key, 3)

    tokens = jax.random.randint(k_tok, (B, S), 1, VOCAB, dtype=jnp.int32)
    tokens = tokens.at[1, 6:].set(0)                       # padding in batch item 1
    segments = jax.random.randint(k_seg, (B, S), 1, 3, dtype=jnp.int32)
    segments = jnp.where(tokens > 0, segments, 0)
    mask = (tokens > 0).astype(jnp.float32)                # 1 = valid, 0 = pad

    # TODO(synk): checkpoint load (`torch.load('models/bert.model.ep100')`) replaced by
    # deterministic in-script init; dropout is a no-op because forward runs in eval mode.
    params = init_params(k_par, VOCAB, H, N_LAYERS)

    top_vec = bert_forward(tokens, segments, mask, params, N_HEADS)
    top_vec = jax.block_until_ready(top_vec)
    assert top_vec.shape == (B, S, H) and top_vec.dtype == jnp.float32
    assert bool(jnp.all(jnp.isfinite(top_vec)))
    print("KERNEL_OK")
</pallas_src>

<mosaic_0001>
module attributes {stable_mosaic.version = 11 : i64} {
  func.func @transformer_block_kernel(%arg0: i32, %arg1: memref<1x8x32xf32, #tpu.memory_space<vmem>>, %arg2: memref<1x1x8xf32, #tpu.memory_space<vmem>>, %arg3: memref<1x32xf32, #tpu.memory_space<vmem>>, %arg4: memref<1x32xf32, #tpu.memory_space<vmem>>, %arg5: memref<32x32xbf16, #tpu.memory_space<vmem>>, %arg6: memref<1x32xf32, #tpu.memory_space<vmem>>, %arg7: memref<32x32xbf16, #tpu.memory_space<vmem>>, %arg8: memref<1x32xf32, #tpu.memory_space<vmem>>, %arg9: memref<32x32xbf16, #tpu.memory_space<vmem>>, %arg10: memref<1x32xf32, #tpu.memory_space<vmem>>, %arg11: memref<32x32xbf16, #tpu.memory_space<vmem>>, %arg12: memref<1x32xf32, #tpu.memory_space<vmem>>, %arg13: memref<1x32xf32, #tpu.memory_space<vmem>>, %arg14: memref<1x32xf32, #tpu.memory_space<vmem>>, %arg15: memref<32x128xbf16, #tpu.memory_space<vmem>>, %arg16: memref<1x128xf32, #tpu.memory_space<vmem>>, %arg17: memref<128x32xbf16, #tpu.memory_space<vmem>>, %arg18: memref<1x32xf32, #tpu.memory_space<vmem>>, %arg19: memref<1x8x32xf32, #tpu.memory_space<vmem>>) attributes {dimension_semantics = [#tpu.dimension_semantics<parallel>], iteration_bounds = array<i64: 2>, scalar_prefetch = 0 : i64, scratch_operands = 0 : i64, tpu.core_type = #tpu.core_type<tc>, window_params = [{transform_indices = @transform_0, window_bounds = array<i64: 1, 8, 32>}, {transform_indices = @transform_1, window_bounds = array<i64: 1, 1, 8>}, {pipeline_mode = #tpu.pipeline_mode<synchronous>, transform_indices = @transform_2, window_bounds = array<i64: 1, 32>}, {pipeline_mode = #tpu.pipeline_mode<synchronous>, transform_indices = @transform_3, window_bounds = array<i64: 1, 32>}, {pipeline_mode = #tpu.pipeline_mode<synchronous>, transform_indices = @transform_4, window_bounds = array<i64: 32, 32>}, {pipeline_mode = #tpu.pipeline_mode<synchronous>, transform_indices = @transform_5, window_bounds = array<i64: 1, 32>}, {pipeline_mode = #tpu.pipeline_mode<synchronous>, transform_indices = @transform_6, window_bounds = array<i64: 32, 32>}, {pipeline_mode = #tpu.pipeline_mode<synchronous>, transform_indices = @transform_7, window_bounds = array<i64: 1, 32>}, {pipeline_mode = #tpu.pipeline_mode<synchronous>, transform_indices = @transform_8, window_bounds = array<i64: 32, 32>}, {pipeline_mode = #tpu.pipeline_mode<synchronous>, transform_indices = @transform_9, window_bounds = array<i64: 1, 32>}, {pipeline_mode = #tpu.pipeline_mode<synchronous>, transform_indices = @transform_10, window_bounds = array<i64: 32, 32>}, {pipeline_mode = #tpu.pipeline_mode<synchronous>, transform_indices = @transform_11, window_bounds = array<i64: 1, 32>}, {pipeline_mode = #tpu.pipeline_mode<synchronous>, transform_indices = @transform_12, window_bounds = array<i64: 1, 32>}, {pipeline_mode = #tpu.pipeline_mode<synchronous>, transform_indices = @transform_13, window_bounds = array<i64: 1, 32>}, {pipeline_mode = #tpu.pipeline_mode<synchronous>, transform_indices = @transform_14, window_bounds = array<i64: 32, 128>}, {pipeline_mode = #tpu.pipeline_mode<synchronous>, transform_indices = @transform_15, window_bounds = array<i64: 1, 128>}, {pipeline_mode = #tpu.pipeline_mode<synchronous>, transform_indices = @transform_16, window_bounds = array<i64: 128, 32>}, {pipeline_mode = #tpu.pipeline_mode<synchronous>, transform_indices = @transform_17, window_bounds = array<i64: 1, 32>}, {transform_indices = @transform_18, window_bounds = array<i64: 1, 8, 32>}]} {
    %c0 = arith.constant 0 : index
    %c0_0 = arith.constant 0 : index
    %c0_1 = arith.constant 0 : index
    %0 = vector.load %arg1[%c0, %c0_0, %c0_1] : memref<1x8x32xf32, #tpu.memory_space<vmem>>, vector<1x8x32xf32>
    %1 = vector.shape_cast %0 : vector<1x8x32xf32> to vector<8x32xf32>
    %c0_2 = arith.constant 0 : index
    %c0_3 = arith.constant 0 : index
    %2 = vector.load %arg3[%c0_2, %c0_3] : memref<1x32xf32, #tpu.memory_space<vmem>>, vector<1x32xf32>
    %c0_4 = arith.constant 0 : index
    %c0_5 = arith.constant 0 : index
    %3 = vector.load %arg4[%c0_4, %c0_5] : memref<1x32xf32, #tpu.memory_space<vmem>>, vector<1x32xf32>
    %cst = arith.constant dense<0.000000e+00> : vector<8xf32>
    %4 = vector.multi_reduction <add>, %1, %cst [1] : vector<8x32xf32> to vector<8xf32>
    %5 = vector.shape_cast %4 : vector<8xf32> to vector<8x1xf32>
    %cst_6 = arith.constant 3.200000e+01 : f32
    %6 = vector.broadcast %cst_6 : f32 to vector<8x1xf32>
    %7 = arith.divf %5, %6 : vector<8x1xf32>
    %8 = vector.broadcast %7 : vector<8x1xf32> to vector<8x32xf32>
    %9 = arith.subf %1, %8 : vector<8x32xf32>
    %10 = arith.mulf %9, %9 : vector<8x32xf32>
    %cst_7 = arith.constant dense<0.000000e+00> : vector<8xf32>
    %11 = vector.multi_reduction <add>, %10, %cst_7 [1] : vector<8x32xf32> to vector<8xf32>
    %12 = vector.shape_cast %11 : vector<8xf32> to vector<8x1xf32>
    %cst_8 = arith.constant 3.100000e+01 : f32
    %13 = vector.broadcast %cst_8 : f32 to vector<8x1xf32>
    %14 = arith.divf %12, %13 : vector<8x1xf32>
    %15 = math.sqrt %14 : vector<8x1xf32>
    %16 = vector.broadcast %2 : vector<1x32xf32> to vector<8x32xf32>
    %17 = arith.mulf %16, %9 : vector<8x32xf32>
    %cst_9 = arith.constant 9.99999997E-7 : f32
    %18 = vector.broadcast %cst_9 : f32 to vector<8x1xf32>
    %19 = arith.addf %15, %18 : vector<8x1xf32>
    %20 = vector.broadcast %19 : vector<8x1xf32> to vector<8x32xf32>
    %21 = arith.divf %17, %20 : vector<8x32xf32>
    %22 = vector.broadcast %3 : vector<1x32xf32> to vector<8x32xf32>
    %23 = arith.addf %21, %22 : vector<8x32xf32>
    %24 = arith.truncf %23 : vector<8x32xf32> to vector<8x32xbf16>
    %c0_10 = arith.constant 0 : index
    %c0_11 = arith.constant 0 : index
    %25 = vector.load %arg5[%c0_10, %c0_11] : memref<32x32xbf16, #tpu.memory_space<vmem>>, vector<32x32xbf16>
    %cst_12 = arith.constant dense<0.000000e+00> : vector<8x32xf32>
    %26 = tpu.matmul %24, %25, %cst_12 {dimension_numbers = #tpu.dot_dimension_numbers<[1], [0], [0], [1], [0, 0, 1, 1], [], []>} : vector<8x32xbf16>, vector<32x32xbf16>, vector<8x32xf32> -> vector<8x32xf32>
    %c0_13 = arith.constant 0 : index
    %c0_14 = arith.constant 0 : index
    %27 = vector.load %arg6[%c0_13, %c0_14] : memref<1x32xf32, #tpu.memory_space<vmem>>, vector<1x32xf32>
    %28 = vector.broadcast %27 : vector<1x32xf32> to vector<8x32xf32>
    %29 = arith.addf %26, %28 : vector<8x32xf32>
    %c0_15 = arith.constant 0 : index
    %c0_16 = arith.constant 0 : index
    %30 = vector.load %arg7[%c0_15, %c0_16] : memref<32x32xbf16, #tpu.memory_space<vmem>>, vector<32x32xbf16>
    %cst_17 = arith.constant dense<0.000000e+00> : vector<8x32xf32>
    %31 = tpu.matmul %24, %30, %cst_17 {dimension_numbers = #tpu.dot_dimension_numbers<[1], [0], [0], [1], [0, 0, 1, 1], [], []>} : vector<8x32xbf16>, vector<32x32xbf16>, vector<8x32xf32> -> vector<8x32xf32>
    %c0_18 = arith.constant 0 : index
    %c0_19 = arith.constant 0 : index
    %32 = vector.load %arg8[%c0_18, %c0_19] : memref<1x32xf32, #tpu.memory_space<vmem>>, vector<1x32xf32>
    %33 = vector.broadcast %32 : vector<1x32xf32> to vector<8x32xf32>
    %34 = arith.addf %31, %33 : vector<8x32xf32>
    %c0_20 = arith.constant 0 : index
    %c0_21 = arith.constant 0 : index
    %35 = vector.load %arg9[%c0_20, %c0_21] : memref<32x32xbf16, #tpu.memory_space<vmem>>, vector<32x32xbf16>
    %cst_22 = arith.constant dense<0.000000e+00> : vector<8x32xf32>
    %36 = tpu.matmul %24, %35, %cst_22 {dimension_numbers = #tpu.dot_dimension_numbers<[1], [0], [0], [1], [0, 0, 1, 1], [], []>} : vector<8x32xbf16>, vector<32x32xbf16>, vector<8x32xf32> -> vector<8x32xf32>
    %c0_23 = arith.constant 0 : index
    %c0_24 = arith.constant 0 : index
    %37 = vector.load %arg10[%c0_23, %c0_24] : memref<1x32xf32, #tpu.memory_space<vmem>>, vector<1x32xf32>
    %38 = vector.broadcast %37 : vector<1x32xf32> to vector<8x32xf32>
    %39 = arith.addf %36, %38 : vector<8x32xf32>
    %cst_25 = arith.constant 0.353553385 : f32
    %40 = vector.broadcast %cst_25 : f32 to vector<8x32xf32>
    %41 = arith.mulf %29, %40 : vector<8x32xf32>
    %42 = vector.shape_cast %41 : vector<8x32xf32> to vector<8x4x8xf32>
    %43 = tpu.transpose %42, [1, 0, 2] : vector<8x4x8xf32> -> vector<4x8x8xf32>
    %44 = arith.truncf %43 : vector<4x8x8xf32> to vector<4x8x8xbf16>
    %45 = vector.shape_cast %34 : vector<8x32xf32> to vector<8x4x8xf32>
    %46 = tpu.transpose %45, [1, 0, 2] : vector<8x4x8xf32> -> vector<4x8x8xf32>
    %47 = arith.truncf %46 : vector<4x8x8xf32> to vector<4x8x8xbf16>
    %48 = vector.shape_cast %39 : vector<8x32xf32> to vector<8x4x8xf32>
    %49 = tpu.transpose %48, [1, 0, 2] : vector<8x4x8xf32> -> vector<4x8x8xf32>
    %50 = arith.truncf %49 : vector<4x8x8xf32> to vector<4x8x8xbf16>
    "tpu.trace_start"() <{level = 10 : i32, message = "hqd,hkd->hqk"}> : () -> ()
    %cst_26 = arith.constant dense<0.000000e+00> : vector<4x8x8xf32>
    %51 = tpu.matmul %44, %47, %cst_26 {dimension_numbers = #tpu.dot_dimension_numbers<[2], [2], [1], [1], [0, 0, 0, 1, 1, 1], [0], [0]>} : vector<4x8x8xbf16>, vector<4x8x8xbf16>, vector<4x8x8xf32> -> vector<4x8x8xf32>
    "tpu.trace_stop"() : () -> ()
    %c0_27 = arith.constant 0 : index
    %c0_28 = arith.constant 0 : index
    %c0_29 = arith.constant 0 : index
    %52 = vector.load %arg2[%c0_27, %c0_28, %c0_29] : memref<1x1x8xf32, #tpu.memory_space<vmem>>, vector<1x1x8xf32>
    %53 = vector.shape_cast %52 : vector<1x1x8xf32> to vector<1x8xf32>
    %54 = vector.shape_cast %53 : vector<1x8xf32> to vector<1x1x8xf32>
    %55 = vector.broadcast %54 : vector<1x1x8xf32> to vector<4x8x8xf32>
    %56 = arith.addf %51, %55 : vector<4x8x8xf32>
    %cst_30 = arith.constant dense<0xFF800000> : vector<4x8xf32>
    %57 = vector.multi_reduction <maximumf>, %56, %cst_30 [2] : vector<4x8x8xf32> to vector<4x8xf32>
    %58 = vector.shape_cast %57 : vector<4x8xf32> to vector<4x8x1xf32>
    %59 = vector.broadcast %58 : vector<4x8x1xf32> to vector<4x8x8xf32>
    %60 = arith.subf %56, %59 : vector<4x8x8xf32>
    %61 = math.exp %60 : vector<4x8x8xf32>
    %cst_31 = arith.constant dense<0.000000e+00> : vector<4x8xf32>
    %62 = vector.multi_reduction <add>, %61, %cst_31 [2] : vector<4x8x8xf32> to vector<4x8xf32>
    %63 = vector.shape_cast %62 : vector<4x8xf32> to vector<4x8x1xf32>
    %64 = tpu.reciprocal %63 {approx = true} : vector<4x8x1xf32> -> vector<4x8x1xf32>
    %65 = vector.broadcast %64 : vector<4x8x1xf32> to vector<4x8x8xf32>
    %66 = arith.mulf %61, %65 : vector<4x8x8xf32>
    %67 = arith.truncf %66 : vector<4x8x8xf32> to vector<4x8x8xbf16>
    "tpu.trace_start"() <{level = 10 : i32, message = "hqk,hkd->hqd"}> : () -> ()
    %cst_32 = arith.constant dense<0.000000e+00> : vector<4x8x8xf32>
    %68 = tpu.matmul %67, %50, %cst_32 {dimension_numbers = #tpu.dot_dimension_numbers<[2], [1], [1], [2], [0, 0, 0, 1, 1, 2], [0], [0]>} : vector<4x8x8xbf16>, vector<4x8x8xbf16>, vector<4x8x8xf32> -> vector<4x8x8xf32>
    "tpu.trace_stop"() : () -> ()
    %69 = tpu.transpose %68, [1, 0, 2] : vector<4x8x8xf32> -> vector<8x4x8xf32>
    %70 = vector.shape_cast %69 : vector<8x4x8xf32> to vector<8x32xf32>
    %71 = arith.truncf %70 : vector<8x32xf32> to vector<8x32xbf16>
    %c0_33 = arith.constant 0 : index
    %c0_34 = arith.constant 0 : index
    %72 = vector.load %arg11[%c0_33, %c0_34] : memref<32x32xbf16, #tpu.memory_space<vmem>>, vector<32x32xbf16>
    %cst_35 = arith.constant dense<0.000000e+00> : vector<8x32xf32>
    %73 = tpu.matmul %71, %72, %cst_35 {dimension_numbers = #tpu.dot_dimension_numbers<[1], [0], [0], [1], [0, 0, 1, 1], [], []>} : vector<8x32xbf16>, vector<32x32xbf16>, vector<8x32xf32> -> vector<8x32xf32>
    %c0_36 = arith.constant 0 : index
    %c0_37 = arith.constant 0 : index
    %74 = vector.load %arg12[%c0_36, %c0_37] : memref<1x32xf32, #tpu.memory_space<vmem>>, vector<1x32xf32>
    %75 = vector.broadcast %74 : vector<1x32xf32> to vector<8x32xf32>
    %76 = arith.addf %73, %75 : vector<8x32xf32>
    %77 = arith.addf %1, %76 : vector<8x32xf32>
    %c0_38 = arith.constant 0 : index
    %c0_39 = arith.constant 0 : index
    %78 = vector.load %arg13[%c0_38, %c0_39] : memref<1x32xf32, #tpu.memory_space<vmem>>, vector<1x32xf32>
    %c0_40 = arith.constant 0 : index
    %c0_41 = arith.constant 0 : index
    %79 = vector.load %arg14[%c0_40, %c0_41] : memref<1x32xf32, #tpu.memory_space<vmem>>, vector<1x32xf32>
    %cst_42 = arith.constant dense<0.000000e+00> : vector<8xf32>
    %80 = vector.multi_reduction <add>, %77, %cst_42 [1] : vector<8x32xf32> to vector<8xf32>
    %81 = vector.shape_cast %80 : vector<8xf32> to vector<8x1xf32>
    %cst_43 = arith.constant 3.200000e+01 : f32
    %82 = vector.broadcast %cst_43 : f32 to vector<8x1xf32>
    %83 = arith.divf %81, %82 : vector<8x1xf32>
    %84 = vector.broadcast %83 : vector<8x1xf32> to vector<8x32xf32>
    %85 = arith.subf %77, %84 : vector<8x32xf32>
    %86 = arith.mulf %85, %85 : vector<8x32xf32>
    %cst_44 = arith.constant dense<0.000000e+00> : vector<8xf32>
    %87 = vector.multi_reduction <add>, %86, %cst_44 [1] : vector<8x32xf32> to vector<8xf32>
    %88 = vector.shape_cast %87 : vector<8xf32> to vector<8x1xf32>
    %cst_45 = arith.constant 3.100000e+01 : f32
    %89 = vector.broadcast %cst_45 : f32 to vector<8x1xf32>
    %90 = arith.divf %88, %89 : vector<8x1xf32>
    %91 = math.sqrt %90 : vector<8x1xf32>
    %92 = vector.broadcast %78 : vector<1x32xf32> to vector<8x32xf32>
    %93 = arith.mulf %92, %85 : vector<8x32xf32>
    %cst_46 = arith.constant 9.99999997E-7 : f32
    %94 = vector.broadcast %cst_46 : f32 to vector<8x1xf32>
    %95 = arith.addf %91, %94 : vector<8x1xf32>
    %96 = vector.broadcast %95 : vector<8x1xf32> to vector<8x32xf32>
    %97 = arith.divf %93, %96 : vector<8x32xf32>
    %98 = vector.broadcast %79 : vector<1x32xf32> to vector<8x32xf32>
    %99 = arith.addf %97, %98 : vector<8x32xf32>
    %100 = arith.truncf %99 : vector<8x32xf32> to vector<8x32xbf16>
    %c0_47 = arith.constant 0 : index
    %c0_48 = arith.constant 0 : index
    %101 = vector.load %arg15[%c0_47, %c0_48] : memref<32x128xbf16, #tpu.memory_space<vmem>>, vector<32x128xbf16>
    %cst_49 = arith.constant dense<0.000000e+00> : vector<8x128xf32>
    %102 = tpu.matmul %100, %101, %cst_49 {dimension_numbers = #tpu.dot_dimension_numbers<[1], [0], [0], [1], [0, 0, 1, 1], [], []>} : vector<8x32xbf16>, vector<32x128xbf16>, vector<8x128xf32> -> vector<8x128xf32>
    %c0_50 = arith.constant 0 : index
    %c0_51 = arith.constant 0 : index
    %103 = vector.load %arg16[%c0_50, %c0_51] : memref<1x128xf32, #tpu.memory_space<vmem>>, vector<1x128xf32>
    %104 = vector.broadcast %103 : vector<1x128xf32> to vector<8x128xf32>
    %105 = arith.addf %102, %104 : vector<8x128xf32>
    %cst_52 = arith.constant 5.000000e-01 : f32
    %106 = vector.broadcast %cst_52 : f32 to vector<8x128xf32>
    %107 = arith.mulf %106, %105 : vector<8x128xf32>
    %cst_53 = arith.constant 4.471500e-02 : f32
    %108 = vector.broadcast %cst_53 : f32 to vector<8x128xf32>
    %109 = arith.mulf %108, %105 : vector<8x128xf32>
    %110 = arith.mulf %109, %105 : vector<8x128xf32>
    %111 = arith.mulf %110, %105 : vector<8x128xf32>
    %112 = arith.addf %105, %111 : vector<8x128xf32>
    %cst_54 = arith.constant 0.797884583 : f32
    %113 = vector.broadcast %cst_54 : f32 to vector<8x128xf32>
    %114 = arith.mulf %113, %112 : vector<8x128xf32>
    %115 = math.tanh %114 : vector<8x128xf32>
    %cst_55 = arith.constant 1.000000e+00 : f32
    %116 = vector.broadcast %cst_55 : f32 to vector<8x128xf32>
    %117 = arith.addf %116, %115 : vector<8x128xf32>
    %118 = arith.mulf %107, %117 : vector<8x128xf32>
    %119 = arith.truncf %118 : vector<8x128xf32> to vector<8x128xbf16>
    %c0_56 = arith.constant 0 : index
    %c0_57 = arith.constant 0 : index
    %120 = vector.load %arg17[%c0_56, %c0_57] : memref<128x32xbf16, #tpu.memory_space<vmem>>, vector<128x32xbf16>
    %cst_58 = arith.constant dense<0.000000e+00> : vector<8x32xf32>
    %121 = tpu.matmul %119, %120, %cst_58 {dimension_numbers = #tpu.dot_dimension_numbers<[1], [0], [0], [1], [0, 0, 1, 1], [], []>} : vector<8x128xbf16>, vector<128x32xbf16>, vector<8x32xf32> -> vector<8x32xf32>
    %c0_59 = arith.constant 0 : index
    %c0_60 = arith.constant 0 : index
    %122 = vector.load %arg18[%c0_59, %c0_60] : memref<1x32xf32, #tpu.memory_space<vmem>>, vector<1x32xf32>
    %123 = vector.broadcast %122 : vector<1x32xf32> to vector<8x32xf32>
    %124 = arith.addf %121, %123 : vector<8x32xf32>
    %125 = arith.addf %77, %124 : vector<8x32xf32>
    %c0_61 = arith.constant 0 : index
    %c0_62 = arith.constant 0 : index
    %c0_63 = arith.constant 0 : index
    %126 = vector.load %arg19[%c0_61, %c0_62, %c0_63] : memref<1x8x32xf32, #tpu.memory_space<vmem>>, vector<1x8x32xf32>
    %127 = vector.shape_cast %126 : vector<1x8x32xf32> to vector<8x32xf32>
    %128 = vector.shape_cast %125 : vector<8x32xf32> to vector<1x8x32xf32>
    tpu.vector_store %arg19[%c0_61, %c0_62, %c0_63], %128 {strides = array<i32>} : memref<1x8x32xf32, #tpu.memory_space<vmem>>, vector<1x8x32xf32>,
    return
  }
  func.func @transform_0(%arg0: i32) -> (i32, i32, i32) {
    %c0_i32 = arith.constant 0 : i32
    %c0_i32_0 = arith.constant 0 : i32
    %c0_i32_1 = arith.constant 0 : i32
    return %arg0, %c0_i32, %c0_i32_0 : i32, i32, i32
  }
  func.func @transform_1(%arg0: i32) -> (i32, i32, i32) {
    %c0_i32 = arith.constant 0 : i32
    %c0_i32_0 = arith.constant 0 : i32
    %c0_i32_1 = arith.constant 0 : i32
    return %arg0, %c0_i32, %c0_i32_0 : i32, i32, i32
  }
  func.func @transform_2(%arg0: i32) -> (i32, i32) {
    %c0_i32 = arith.constant 0 : i32
    %c0_i32_0 = arith.constant 0 : i32
    %c0_i32_1 = arith.constant 0 : i32
    return %c0_i32, %c0_i32_0 : i32, i32
  }
  func.func @transform_3(%arg0: i32) -> (i32, i32) {
    %c0_i32 = arith.constant 0 : i32
    %c0_i32_0 = arith.constant 0 : i32
    %c0_i32_1 = arith.constant 0 : i32
    return %c0_i32, %c0_i32_0 : i32, i32
  }
  func.func @transform_4(%arg0: i32) -> (i32, i32) {
    %c0_i32 = arith.constant 0 : i32
    %c0_i32_0 = arith.constant 0 : i32
    %c0_i32_1 = arith.constant 0 : i32
    return %c0_i32, %c0_i32_0 : i32, i32
  }
  func.func @transform_5(%arg0: i32) -> (i32, i32) {
    %c0_i32 = arith.constant 0 : i32
    %c0_i32_0 = arith.constant 0 : i32
    %c0_i32_1 = arith.constant 0 : i32
    return %c0_i32, %c0_i32_0 : i32, i32
  }
  func.func @transform_6(%arg0: i32) -> (i32, i32) {
    %c0_i32 = arith.constant 0 : i32
    %c0_i32_0 = arith.constant 0 : i32
    %c0_i32_1 = arith.constant 0 : i32
    return %c0_i32, %c0_i32_0 : i32, i32
  }
  func.func @transform_7(%arg0: i32) -> (i32, i32) {
    %c0_i32 = arith.constant 0 : i32
    %c0_i32_0 = arith.constant 0 : i32
    %c0_i32_1 = arith.constant 0 : i32
    return %c0_i32, %c0_i32_0 : i32, i32
  }
  func.func @transform_8(%arg0: i32) -> (i32, i32) {
    %c0_i32 = arith.constant 0 : i32
    %c0_i32_0 = arith.constant 0 : i32
    %c0_i32_1 = arith.constant 0 : i32
    return %c0_i32, %c0_i32_0 : i32, i32
  }
  func.func @transform_9(%arg0: i32) -> (i32, i32) {
    %c0_i32 = arith.constant 0 : i32
    %c0_i32_0 = arith.constant 0 : i32
    %c0_i32_1 = arith.constant 0 : i32
    return %c0_i32, %c0_i32_0 : i32, i32
  }
  func.func @transform_10(%arg0: i32) -> (i32, i32) {
    %c0_i32 = arith.constant 0 : i32
    %c0_i32_0 = arith.constant 0 : i32
    %c0_i32_1 = arith.constant 0 : i32
    return %c0_i32, %c0_i32_0 : i32, i32
  }
  func.func @transform_11(%arg0: i32) -> (i32, i32) {
    %c0_i32 = arith.constant 0 : i32
    %c0_i32_0 = arith.constant 0 : i32
    %c0_i32_1 = arith.constant 0 : i32
    return %c0_i32, %c0_i32_0 : i32, i32
  }
  func.func @transform_12(%arg0: i32) -> (i32, i32) {
    %c0_i32 = arith.constant 0 : i32
    %c0_i32_0 = arith.constant 0 : i32
    %c0_i32_1 = arith.constant 0 : i32
    return %c0_i32, %c0_i32_0 : i32, i32
  }
  func.func @transform_13(%arg0: i32) -> (i32, i32) {
    %c0_i32 = arith.constant 0 : i32
    %c0_i32_0 = arith.constant 0 : i32
    %c0_i32_1 = arith.constant 0 : i32
    return %c0_i32, %c0_i32_0 : i32, i32
  }
  func.func @transform_14(%arg0: i32) -> (i32, i32) {
    %c0_i32 = arith.constant 0 : i32
    %c0_i32_0 = arith.constant 0 : i32
    %c0_i32_1 = arith.constant 0 : i32
    return %c0_i32, %c0_i32_0 : i32, i32
  }
  func.func @transform_15(%arg0: i32) -> (i32, i32) {
    %c0_i32 = arith.constant 0 : i32
    %c0_i32_0 = arith.constant 0 : i32
    %c0_i32_1 = arith.constant 0 : i32
    return %c0_i32, %c0_i32_0 : i32, i32
  }
  func.func @transform_16(%arg0: i32) -> (i32, i32) {
    %c0_i32 = arith.constant 0 : i32
    %c0_i32_0 = arith.constant 0 : i32
    %c0_i32_1 = arith.constant 0 : i32
    return %c0_i32, %c0_i32_0 : i32, i32
  }
  func.func @transform_17(%arg0: i32) -> (i32, i32) {
    %c0_i32 = arith.constant 0 : i32
    %c0_i32_0 = arith.constant 0 : i32
    %c0_i32_1 = arith.constant 0 : i32
    return %c0_i32, %c0_i32_0 : i32, i32
  }
  func.func @transform_18(%arg0: i32) -> (i32, i32, i32) {
    %c0_i32 = arith.constant 0 : i32
    %c0_i32_0 = arith.constant 0 : i32
    %c0_i32_1 = arith.constant 0 : i32
    return %arg0, %c0_i32, %c0_i32_0 : i32, i32, i32
  }
}

</mosaic_0001>

<bundles_post_ra>
// kernel: tpu_custom_call.1
= control target key start
LH: loop header
LB: loop body
LE: loop exit
PB: predicated region body
PF: predicated region fallthrough
CT: control target
= control target key end

     0   :  { %s3536_s0 = inlined_call_operand.vmem [shape: f32[2,8,32], index: 0, kind: input, shape index: {}]   ;;  %s3537_s1 = inlined_call_operand.vmem [shape: f32[2,1,8], index: 1, kind: input, shape index: {}]   ;;  %s3538_s2 = inlined_call_operand.hbm [shape: f32[1,32], index: 2, kind: input, shape index: {}]   ;;  %s3539_s3 = inlined_call_operand.hbm [shape: f32[1,32], index: 3, kind: input, shape index: {}]   ;;  %s3540_s4 = inlined_call_operand.vmem [shape: bf16[32,32], index: 4, kind: input, shape index: {}]   ;;  %s3541_s5 = inlined_call_operand.hbm [shape: f32[1,32], index: 5, kind: input, shape index: {}]   ;;  %s3542_s6 = inlined_call_operand.vmem [shape: bf16[32,32], index: 6, kind: input, shape index: {}]   ;;  %s3543_s7 = inlined_call_operand.hbm [shape: f32[1,32], index: 7, kind: input, shape index: {}]   ;;  %s3544_s8 = inlined_call_operand.vmem [shape: bf16[32,32], index: 8, kind: input, shape index: {}]   ;;  %s3545_s9 = inlined_call_operand.hbm [shape: f32[1,32], index: 9, kind: input, shape index: {}]   ;;  %s3546_s10 = inlined_call_operand.vmem [shape: bf16[32,32], index: 10, kind: input, shape index: {}]   ;;  %s3547_s11 = inlined_call_operand.vmem [shape: f32[1,32], index: 11, kind: input, shape index: {}]   ;;  %s3548_s12 = inlined_call_operand.vmem [shape: f32[1,32], index: 12, kind: input, shape index: {}]   ;;  %s3549_s13 = inlined_call_operand.vmem [shape: f32[1,32], index: 13, kind: input, shape index: {}]   ;;  %s3550_s14 = inlined_call_operand.vmem [shape: bf16[32,128], index: 14, kind: input, shape index: {}]   ;;  %s3551_s15 = inlined_call_operand.vmem [shape: f32[1,128], index: 15, kind: input, shape index: {}]   ;;  %s3552_s16 = inlined_call_operand.vmem [shape: bf16[128,32], index: 16, kind: input, shape index: {}]   ;;  %s3553_s17 = inlined_call_operand.vmem [shape: f32[1,32], index: 17, kind: input, shape index: {}]   ;;  %s3554_s18 = inlined_call_operand.hbm [shape: f32[2,8,32], index: 18, kind: output, shape index: {}]  }
   0x1   :  { %3568 = sst [smem:[#allocation23_spill]] %s3536_s0 }
   0x2   :  { %3569 = sst [smem:[#allocation24_spill]] %s3537_s1 }
   0x3   :  { %3570 = sst [smem:[#allocation25_spill]] %s3538_s2 }
   0x4   :  { %3571 = sst [smem:[#allocation26_spill]] %s3539_s3 }
   0x5   :  { %3572 = sst [smem:[#allocation27_spill]] %s3543_s7 }
   0x6   :  { %3573 = sst [smem:[#allocation28_spill]] %s3553_s17 }
   0x7   :  { %3574 = sst [smem:[#allocation29_spill]] %s3554_s18 }
   0x8   :  { %23 = vsyncpa [#allocation3], 0 }
   0x9   :  { %24 = vsyncpa [#allocation6], 0 }
   0xa   :  { %25 = vsyncpa [#allocation9], 0 }
   0xb   :  { %26 = vsyncpa [#allocation4], 0 }
   0xc   :  { %28 = vsyncpa [#allocation4 + $0x1], 0  ;;  %s3026_s27 = smov 0   ;;  %s3028_s28 = smov 0  }
   0xd   :  { %s3030_s29 = smov 0   ;;  %s3032_s30 = smov 0  }
   0xe LB: > { %3575 = sst [smem:[#allocation16_spill]] %s2901_s27  ;;  %s3047_s0 = sadd.s32 4294967295, %s2913_s30   ;;  %s2913_s30 = sphi %s3032_s30, %s3607_s30   ;;  %s2909_s29 = sphi %s3030_s29, %s3609_s29   ;;  %s2905_s28 = sphi %s3028_s28, %s3611_s28   ;;  %s2901_s27 = sphi %s3026_s27, %s3610_s27  }
   0xf   : > { %3576 = sst [smem:[#allocation17_spill]] %s2909_s29  ;;  %s2337_s19 = sadd.s32 4294967294, %s2913_s30  }
  0x10   : > { %3577 = sst [smem:[#allocation18_spill]] %s2913_s30  ;;  %s3051_s1 = sadd.s32 1, %s2913_s30  }
  0x11   : > { %3578 = sst [smem:[#allocation19_spill]] %s3051_s1  ;;  %s429_s20 = sadd.s32 1, %s2909_s29 }
  0x12   : > { %s426_s21 = ssub.s32 %s2913_s30, %s3051_s1  ;;  %p439_p0 = scmp.ne.s32.totalorder %s2909_s29, %s2905_s28 }
  0x13   : > { %p427_p1 = scmp.eq.s32.totalorder %s426_s21, 0  ;;  %p440_p2 = scmp.eq.s32.totalorder %s3047_s0, 1 }
  0x14   : > { %p445_p3 = scmp.ne.s32.totalorder %s2905_s28, %s2901_s27  ;;  %p446_p4 = scmp.eq.s32.totalorder %s2337_s19, 1 }
  0x15   : > { %s3062_s22 = scalar_select %p427_p1, %s2909_s29, %s429_s20  }
  0x16   : > { %p3064_p5 = por %p440_p2, %p439_p0  ;;  %p3068_p6 = por %p446_p4, %p445_p3 }
  0x17   : > { %3579 = sst [smem:[#allocation20_spill]] %s3062_s22  ;;  %p2338_p7 = scmp.ge.s32.totalorder %s2913_s30, 1 }
  0x18   : > { %s3580_s2 = scalar_select %p3064_p5, 1, 0 }
  0x19   : > { %s3582_s23 = scalar_select %p3068_p6, 1, 0 }
  0x1a   : > { %3581 = sst [smem:[#allocation21_spill]] %s3580_s2  ;;  %p453_p8 = scmp.lt.s32.totalorder %s2913_s30, 3 }
  0x1b   : > { %3583 = sst [smem:[#allocation22_spill]] %s3582_s23  ;;  %p3563_p9 = scmp.eq.s32.totalorder %s3047_s0, 0 }
  0x1c   : > { %p3075_p10 = pnand %p2338_p7, %p453_p8  ;;  %s2915_s25 = smov [#allocation5]  }
  0x1d   : > { %s477_s26 = sshll.u32 %s2915_s25, 4  ;;  %s2916_s19 = smov [#allocation8]   ;;  %s478_s26 = int_to_ptr.vmem [resolvable:$true] %s477_s26 }
  0x1e   : > { %s3584_s24 = scalar_select %p3075_p10, 1, 0 }
  0x1f   : > { %p2577_p11 = pneg %p3075_p10  ;;  %s505_s20 = sshll.u32 %s2916_s19, 4  ;;  %s3087_s20 = int_to_ptr.vmem [resolvable:$true] %s505_s20 }
  0x20   : > { %s2917_s22 = smov [#allocation2]   ;;  %s3586_s3 = sld [smem:[#allocation26_spill]] }
  0x21   : > { %p3083_p12 = pnand %p3563_p9, %p2577_p11  ;;  %s466_s29 = sshll.u32 %s2917_s22, 4  ;;  %s3089_s29 = int_to_ptr.vmem [resolvable:$true] %s466_s29 }
  0x23   : > { %p3099_p0 = pneg %p3083_p12 }
  0x26   : > { %s2699_s25 = scalar_lea.hbm %s3586_s3, 16 }
  0x27   : > { %p2700_p13 = scmp.ne.s32.totalorder %s3586_s3, %s2699_s25  ;;  %p2706_p3 = scmp.lt.u32.totalorder %s2699_s25, %s3586_s3 }
  0x29   : > { %p2702_p1 = pnand %p3099_p0, %p2700_p13 }
  0x2b   : > { %p2703_p2 = pneg %p2702_p1 }
  0x2d   : > { %p2708_p4 = pnand %p2706_p3, %p2703_p2 }
  0x2f   : > { %2711 = shalt.err (!%p2708_p4)
}
  0x30   : > { %s2712_s1 = scalar_lea.vmem %s478_s26, 16  ;;  %s2719_s27 = scalar_lea.vmem %s478_s26, 32 }
  0x31   : > { %p2713_p7 = scmp.ne.s32.totalorder %s478_s26, %s2712_s1  ;;  %p2720_p9 = scmp.lt.s32.totalorder %s478_s26, %s478_s26 }
  0x32   : > { %p2721_p6 = scmp.lt.s32.totalorder %s2719_s27, %s2712_s1 }
  0x33   : > { %p2715_p8 = pnand %p2713_p7, %p3099_p0 }
  0x34   : > { %p2722_p5 = por %p2721_p6, %p2720_p9 }
  0x35   : > { %p2716_p11 = pneg %p2715_p8 }
  0x37   : > { %p2723_p10 = pnand %p2722_p5, %p2716_p11 }
  0x39   : > { %2726 = shalt.err (!%p2723_p10)
}
  0x3a   : > { %2583 = dma.hbm_to_vmem [thread:$0]  (!%p3083_p12), %s3586_s3, 16, %s478_s26, [#allocation6]  }
  0x3b   : > { %s3588_s7 = sld [smem:[#allocation27_spill]] }
  0x41   : > { %s2727_s22 = scalar_lea.hbm %s3588_s7, 16 }
  0x42   : > { %p2728_p13 = scmp.ne.s32.totalorder %s3588_s7, %s2727_s22  ;;  %p2734_p5 = scmp.lt.u32.totalorder %s2727_s22, %s3588_s7 }
  0x44   : > { %p2730_p1 = pnand %p2728_p13, %p3099_p0 }
  0x46   : > { %p2731_p6 = pneg %p2730_p1 }
  0x48   : > { %p2736_p9 = pnand %p2734_p5, %p2731_p6 }
  0x4a   : > { %2739 = shalt.err (!%p2736_p9)
}
  0x4b   : > { %s2740_s26 = scalar_lea.vmem %s3087_s20, 16  ;;  %s2747_s17 = scalar_lea.vmem %s3087_s20, 32 }
  0x4c   : > { %p2741_p10 = scmp.ne.s32.totalorder %s3087_s20, %s2740_s26  ;;  %p2748_p4 = scmp.lt.s32.totalorder %s3087_s20, %s3087_s20 }
  0x4d   : > { %p2749_p7 = scmp.lt.s32.totalorder %s2747_s17, %s2740_s26 }
  0x4e   : > { %p2743_p2 = pnand %p2741_p10, %p3099_p0 }
  0x4f   : > { %p2750_p8 = por %p2749_p7, %p2748_p4 }
  0x50   : > { %p2744_p3 = pneg %p2743_p2 }
  0x52   : > { %p2751_p11 = pnand %p2750_p8, %p2744_p3 }
  0x54   : > { %2754 = shalt.err (!%p2751_p11)
}
  0x55   : > { %2589 = dma.hbm_to_vmem [thread:$0]  (!%p3083_p12), %s3588_s7, 16, %s3087_s20, [#allocation9]  }
  0x56   : > { %s3589_s25 = sld [smem:[#allocation25_spill]] }
  0x5c   : > { %s2755_s22 = scalar_lea.hbm %s3589_s25, 16 }
  0x5d   : > { %p2756_p13 = scmp.ne.s32.totalorder %s3589_s25, %s2755_s22  ;;  %p2762_p5 = scmp.lt.u32.totalorder %s2755_s22, %s3589_s25 }
  0x5f   : > { %p2758_p1 = pnand %p2756_p13, %p3099_p0 }
  0x61   : > { %p2759_p6 = pneg %p2758_p1 }
  0x63   : > { %p2764_p9 = pnand %p2762_p5, %p2759_p6 }
  0x65   : > { %2767 = shalt.err (!%p2764_p9)
}
  0x66   : > { %s2768_s20 = scalar_lea.vmem %s3089_s29, 16  ;;  %s2775_s2 = scalar_lea.vmem %s3089_s29, 32 }
  0x67   : > { %p2769_p10 = scmp.ne.s32.totalorder %s3089_s29, %s2768_s20  ;;  %p2776_p4 = scmp.lt.s32.totalorder %s3089_s29, %s3089_s29 }
  0x68   : > { %p2777_p7 = scmp.lt.s32.totalorder %s2775_s2, %s2768_s20 }
  0x69   : > { %p2771_p2 = pnand %p2769_p10, %p3099_p0 }
  0x6a   : > { %p2778_p8 = por %p2777_p7, %p2776_p4 }
  0x6b   : > { %p2772_p3 = pneg %p2771_p2 }
  0x6d   : > { %p2779_p11 = pnand %p2778_p8, %p2772_p3 }
  0x6f   : > { %2782 = shalt.err (!%p2779_p11)
}
  0x70   : > { %2580 = dma.hbm_to_vmem [thread:$0]  (!%p3083_p12), %s3589_s25, 16, %s3089_s29, [#allocation3]  }
  0x71   : > { %s2918_s18 = smov [#allocation7]   ;;  %s2919_s1 = smov [#allocation10]  }
  0x72   : > { %s491_s22 = sshll.u32 %s2918_s18, 4  ;;  %s519_s27 = sshll.u32 %s2919_s1, 4  ;;  %s492_s22 = int_to_ptr.vmem [resolvable:$true] %s491_s22  ;;  %s520_s27 = int_to_ptr.vmem [resolvable:$true] %s519_s27 }
  0x73   : > { %s2783_s20 = scalar_lea.hbm %s3541_s5, 16 }
  0x74   : > { %p2784_p13 = scmp.ne.s32.totalorder %s3541_s5, %s2783_s20  ;;  %p2790_p5 = scmp.lt.u32.totalorder %s2783_s20, %s3541_s5 }
  0x76   : > { %p2786_p1 = pnand %p2784_p13, %p3099_p0 }
  0x78   : > { %p2787_p6 = pneg %p2786_p1 }
  0x7a   : > { %p2792_p9 = pnand %p2790_p5, %p2787_p6 }
  0x7c   : > { %2795 = shalt.err (!%p2792_p9)
}
  0x7d   : > { %s2796_s29 = scalar_lea.vmem %s492_s22, 16  ;;  %s2803_s23 = scalar_lea.vmem %s492_s22, 32 }
  0x7e   : > { %p2797_p10 = scmp.ne.s32.totalorder %s492_s22, %s2796_s29  ;;  %p2804_p4 = scmp.lt.s32.totalorder %s492_s22, %s492_s22 }
  0x7f   : > { %p2805_p7 = scmp.lt.s32.totalorder %s2803_s23, %s2796_s29 }
  0x80   : > { %p2799_p2 = pnand %p2797_p10, %p3099_p0 }
  0x81   : > { %p2806_p8 = por %p2805_p7, %p2804_p4 }
  0x82   : > { %p2800_p3 = pneg %p2799_p2 }
  0x84   : > { %p2807_p11 = pnand %p2806_p8, %p2800_p3 }
  0x86   : > { %2810 = shalt.err (!%p2807_p11)
}
  0x87   : > { %2586 = dma.hbm_to_vmem [thread:$0]  (!%p3083_p12), %s3541_s5, 16, %s492_s22, [#allocation6]  }
  0x88   : > { %s2811_s26 = scalar_lea.hbm %s3545_s9, 16 }
  0x89   : > { %p2812_p13 = scmp.ne.s32.totalorder %s3545_s9, %s2811_s26  ;;  %p2818_p5 = scmp.lt.u32.totalorder %s2811_s26, %s3545_s9 }
  0x8b   : > { %p2814_p1 = pnand %p2812_p13, %p3099_p0 }
  0x8d   : > { %p2815_p6 = pneg %p2814_p1 }
  0x8f   : > { %p2820_p9 = pnand %p2818_p5, %p2815_p6 }
  0x91   : > { %2823 = shalt.err (!%p2820_p9)
}
  0x92   : > { %s2824_s29 = scalar_lea.vmem %s520_s27, 16  ;;  %s2831_s22 = scalar_lea.vmem %s520_s27, 32 }
  0x93   : > { %p2825_p10 = scmp.ne.s32.totalorder %s520_s27, %s2824_s29  ;;  %p2832_p4 = scmp.lt.s32.totalorder %s520_s27, %s520_s27 }
  0x94   : > { %p2833_p7 = scmp.lt.s32.totalorder %s2831_s22, %s2824_s29 }
  0x95   : > { %p2827_p2 = pnand %p2825_p10, %p3099_p0 }
  0x96   : > { %p2834_p8 = por %p2833_p7, %p2832_p4 }
  0x97   : > { %p2828_p3 = pneg %p2827_p2 }
  0x99   : > { %p2835_p11 = pnand %p2834_p8, %p2828_p3 }
  0x9b   : > { %2838 = shalt.err (!%p2835_p11)
}
  0x9c   : > { %2592 = dma.hbm_to_vmem [thread:$0]  (!%p3083_p12), %s3545_s9, 16, %s520_s27, [#allocation9]  }
  0x9d   : > { %p3590_p13 = scmp.ne.s32.totalorder %s3584_s24, 0 }
  0x9e   : > { %p3591_p1 = scmp.eq.s32.totalorder (!%p3590_p13), %s3047_s0, 0 }
  0x9f   : > { %569 = sbr.rel (%p3590_p13) target bundleno = 2834 (0xb12), region = 92 }
  0xa6   : > { %2884 = dma.done.wait (%p3591_p1), [#allocation3], 16   ;;  %p3592_p0 = pmov %p3591_p1 }
  0xa8   : > { %2886 = vsyncadd (%p3592_p0), [#allocation3], 4294967280  ;;  %p3593_p6 = pmov %p3592_p0 }
  0xa9   : > { %p3594_p5 = pmov %p3592_p0 }
  0xaa   : > { %2888 = dma.done.wait (%p3593_p6), [#allocation6], 32  }
  0xab   : > { %2890 = vsyncadd (%p3594_p5), [#allocation6], 4294967264  ;;  %p3595_p9 = pmov %p3592_p0 }
  0xac   : > { %p3596_p12 = pmov %p3592_p0 }
  0xad   : > { %2892 = dma.done.wait (%p3595_p9), [#allocation9], 32  }
  0xae   : > { %2894 = vsyncadd (%p3596_p12), [#allocation9], 4294967264  ;;  %p641_p10 = scmp.lt.s32.totalorder %s3047_s0, 1  ;;  %s3597_s18 = sld [smem:[#allocation23_spill]]  ;;  %vm652_vm0 = vcmask 261120   ;;  %v2655_v7 = vld [vmem:[%s3540_s4] sm:$0xff]   ;;  %v898_v48 = vlaneseq }
  0xaf   : > { %v2920_v8 = vmov 0.0   ;;  %vm2921_vm1 = vmmov 0   ;;  %v2656_v9 = vld [vmem:[%s3540_s4 + $0x8] sm:$0xff]   ;;  %v2353_v18 = vld [vmem:[#allocation2] ss:$0 sm:$0xff]  ;;  %s2922_s27 = smov 104  }
  0xb0   : > { %s3215_s24 = scalar_select %p641_p10, %s3047_s0, 1  ;;  %2447 = vmatprep.subr.bf16.mxu0 %v2920_v8  ;;  %2451 = vmatprep.mubr.msk.bf16.mxu0 %vm2921_vm1, %v2920_v8  ;;  %v2354_v21 = vld [vmem:[#allocation5] ss:$0 sm:$0xff]  ;;  %v2658_v26 = vld [vmem:[%s3542_s6 + $0x8] sm:$0xff]   ;;  %v2359_v33 = vld [vmem:[#allocation8] ss:$0 sm:$0xff] }
  0xb1   : > { %2448 = vmatpush3.bf16.msra.mxu0 %v2655_v7  ;;  %2471 = vmatprep.subr.bf16.mxu1 %v2920_v8  ;;  %v2657_v24 = vld [vmem:[%s3542_s6] sm:$0xff]   ;;  %v2660_v28 = vld [vmem:[%s3544_s8 + $0x8] sm:$0xff]   ;;  %v2925_v46 = vmov 1983009808   ;;  %v2926_v49 = vmov 1934713408  }
  0xb2   : > { %s2352_s21 = sshll.u32 %s3215_s24, 3  ;;  %2449 = vmatprep.subr.bf16.mxu0 %v2920_v8  ;;  %2473 = vmatprep.mubr.msk.bf16.mxu1 %vm2921_vm1, %v2920_v8  ;;  %v2659_v27 = vld [vmem:[%s3544_s8] sm:$0xff]   ;;  %v896_v47 = vunpack.c.l.s4 %v2925_v46  ;;  %v928_v50 = vunpack.c.l.s4 %v2926_v49  ;;  %v899_v52 = vshrl.u32 %v898_v48, 7  ;;  %vm1340_vm4 = vcmask 64512   ;;  %s3598_s17 = sld [smem:[#allocation24_spill]] }
  0xb3   : > { %v2355_v37 = vld [vmem:[#allocation7] ss:$0 sm:$0xff]  ;;  %vm1576_vm5 = vcmask 1043456   ;;  %s2927_s22 = smov 16   ;;  %s2928_s23 = smov 8   ;;  %vm1907_vm6 = vcmask 130048  }
  0xb4   : > { %s644_s7 = scalar_lea.vmem %s3597_s18, %s2352_s21  ;;  %s2923_s18 = smov 120   ;;  %v897_v51 = vunpack.c.0.s8 %v896_v47  ;;  %v929_v55 = vunpack.c.0.s8 %v928_v50  ;;  %vm1909_vm7 = vcmask 195584  }
  0xb5   : > { %v3221_v0 = vld [vmem:[%s644_s7] sm:$0xff]  ;;  %2450 = vmatpush3.bf16.msra.mxu0 %v2656_v9  ;;  %s2924_s7 = smov 112   ;;  %s2929_s3 = smov 24  }
  0xb6   : > { %v653_v1 = vsel %vm652_vm0, %v3221_v0, 0.0  ;;  %2455 = vmatprep.subr.bf16.mxu0 %v2920_v8  ;;  %v3274_v56 = vsub.s32 %v897_v51, %v899_v52  ;;  %v3276_v62 = vsub.s32 %v929_v55, %v899_v52  ;;  %s638_s29 = sand.u32 1, %s2905_s28   ;;  %s3599_s21 = sld [smem:[#allocation28_spill]] }
  0xb7   : > { %654 = vadd.xlane.f32.xlu0 %v653_v1  ;;  %s3600_s19 = sld [smem:[#allocation21_spill]]  ;;  %s2930_s2 = smov [#allocation11]  }
  0xb8   : > { %s647_s20 = scalar_lea.vmem %s3598_s17, %s3215_s24  ;;  %s3601_s17 = sld [smem:[#allocation29_spill]] }
  0xb9   : > { %s2843_s30 = sshll.u32 %s2930_s2, 4  ;;  %s2844_s30 = int_to_ptr.vmem [resolvable:$false] %s2843_s30 }
  0xbd   : > { %p3602_p3 = scmp.ne.s32.totalorder %s3600_s19, 0 }
 0x144   : > { %v655_v2 = vpop.xlane.xlu0 %654 }
 0x145   : > { %v657_v3 = vmul.f32 0.03125, %v655_v2 }
 0x147   : > { %v658_v4 = vsub.f32 %v3221_v0, %v657_v3 }
 0x149   : > { %v659_v5 = vmul.f32 %v658_v4, %v658_v4  ;;  %v678_v19 = vmul.f32 %v2353_v18, %v658_v4 }
 0x14b   : > { %v660_v6 = vsel %vm652_vm0, %v659_v5, 0.0 }
 0x14c   : > { %661 = vadd.xlane.f32.xlu0 %v660_v6 }
 0x1d9   : > { %v662_v10 = vpop.xlane.xlu0 %661 }
 0x1da   : > { %v664_v11 = vmul.f32 0.032258064, %v662_v10 }
 0x1dc   : > { %2673 = vrsqrt.f32 %v664_v11  ;;  %vm667_vm2 = vcmp.eq.f32.partialorder %v664_v11, inf  ;;  %v670_v14 = vand.u32 2147483648, %v664_v11  ;;  %vm669_vm3 = vcmp.eq.f32.partialorder %v664_v11, 0.0 }
 0x1e6   : > { %v2674_v12 = vpop.eup %2673 }
 0x1e7   : > { %v666_v13 = vmul.f32 %v2674_v12, %v664_v11 }
 0x1e9   : > { %v668_v15 = vsel %vm667_vm2, %v664_v11, %v666_v13 }
 0x1ea   : > { %v671_v16 = vsel %vm669_vm3, %v670_v14, %v668_v15 }
 0x1eb   : > { %v679_v17 = vadd.f32 1e-06, %v671_v16 }
 0x1ed   : > { %2675 = vrcp.f32 %v679_v17 }
 0x1f7   : > { %v2676_v20 = vpop.eup %2675 }
 0x1f8   : > { %v681_v22 = vmul.f32 %v2676_v20, %v678_v19 }
 0x1fa   : > { %v688_v23 = vadd.f32 %v2354_v21, %v681_v22 }
 0x1fc   : > { %v689_v25 = vpack.c.bf16 %v688_v23, %v688_v23 }
 0x1fe   : > { %2452 = vmatmul.mubr.msk.bf16.vlgmr.msra.gmra.mrb[0].mxu0 %vm652_vm0, %v689_v25 }
 0x1ff   : > { %2456 = vmatpush3.bf16.msra.mxu0 %v2657_v24  ;;  %2459 = vmatprep.mubr.msk.bf16.mxu0 %vm2921_vm1, %v2920_v8 }
 0x200   : > { %2457 = vmatprep.subr.bf16.mxu0 %v2920_v8 }
 0x203   : > { %2458 = vmatpush3.bf16.msra.mxu0 %v2658_v26 }
 0x204   : > { %2463 = vmatprep.subr.bf16.mxu0 %v2920_v8 }
 0x206   : > { %2460 = vmatmul.mubr.msk.bf16.vlgmr.msra.gmra.mrb[4].mxu0 %vm652_vm0, %v689_v25 }
 0x207   : > { %2464 = vmatpush3.bf16.msra.mxu0 %v2659_v27  ;;  %2467 = vmatprep.mubr.msk.bf16.mxu0 %vm2921_vm1, %v2920_v8 }
 0x208   : > { %2465 = vmatprep.subr.bf16.mxu0 %v2920_v8 }
 0x20b   : > { %2466 = vmatpush3.bf16.msra.mxu0 %v2660_v28 }
 0x20c   : > { %2477 = vmatprep.subr.bf16.mxu0 %v2920_v8 }
 0x20e   : > { %2468 = vmatmul.mubr.msk.bf16.vlgmr.msra.gmra.mrb[8].mxu0 %vm652_vm0, %v689_v25 }
 0x20f   : > { %2479 = vmatprep.mubr.msk.bf16.mxu0 %vm2921_vm1, %v2920_v8 }
 0x2d1   : > { %v750_v29 = vpop.f32.mrb[0].mxu0 }
 0x2d2   : > { %v2453_v30 = vpop.f32.mrb[1].mxu0  ;;  %v751_v40 = vadd.f32 %v2355_v37, %v750_v29 }
 0x2d3   : > { %v753_v31 = vpop.f32.mrb[2].mxu0 }
 0x2d4   : > { %v2454_v32 = vpop.f32.mrb[3].mxu0  ;;  %v882_v42 = vmul.f32 0.35355338, %v751_v40 }
 0x2d9   : > { %v813_v34 = vpop.f32.mrb[4].mxu0 }
 0x2da   : > { %v814_v35 = vadd.f32 %v2359_v33, %v813_v34  ;;  %v2461_v36 = vpop.f32.mrb[5].mxu0 }
 0x2db   : > { %v816_v38 = vpop.f32.mrb[6].mxu0 }
 0x2dc   : > { %1040 = vrot.lane.b32.xlu0 %v814_v35, %s2922_s27  ;;  %1034 = vrot.lane.b32.xlu1 %v814_v35, %s2923_s18  ;;  %v2462_v39 = vpop.f32.mrb[7].mxu0 }
 0x2e0   : > { %1037 = vrot.lane.b32.xlu1 %v814_v35, %s2924_s7 }
 0x2e1   : > { %v3269_v41 = vpop.f32.mrb[8].mxu0 }
 0x2e2   : > { %v2469_v43 = vpop.f32.mrb[9].mxu0 }
 0x2e3   : > { %v879_v44 = vpop.f32.mrb[10].mxu0 }
 0x2e4   : > { %884 = vrot.lane.b32.xlu1 %v882_v42, %s2923_s18  ;;  %v2470_v45 = vpop.f32.mrb[11].mxu0 }
 0x2e8   : > { %887 = vrot.lane.b32.xlu1 %v882_v42, %s2924_s7 }
 0x2ec   : > { %890 = vrot.lane.b32.xlu1 %v882_v42, %s2922_s27 }
 0x34e   : > { %v1041_v53 = vpop.permute.xlu0 %1040  ;;  %v1035_v54 = vpop.permute.xlu1 %1034 }
 0x34f   : > { %v1059_v57 = vcombine.low %v1035_v54, %v1041_v53  ;;  %v1060_v58 = vcombine.high %v1035_v54, %v1041_v53 }
 0x351   : > { %v1067_v63 = vrot.slane %v1059_v57, %v3274_v56  ;;  %v1074_v1 = vrot.slane %v1060_v58, %v3274_v56 }
 0x352   : > { %v1038_v59 = vpop.permute.xlu1 %1037 }
 0x353   : > { %v1043_v60 = vcombine.low %v814_v35, %v1038_v59  ;;  %v1044_v61 = vcombine.high %v814_v35, %v1038_v59 }
 0x355   : > { %v1051_v2 = vrot.slane %v1043_v60, %v3274_v56  ;;  %v1058_v3 = vrot.slane %v1044_v61, %v3274_v56 }
 0x356   : > { %v885_v4 = vpop.permute.xlu1 %884 }
 0x357   : > { %v1075_v5 = vcombine.low %v1051_v2, %v1067_v63  ;;  %v1076_v6 = vcombine.high %v1051_v2, %v1067_v63  ;;  %v1091_v7 = vcombine.low %v1058_v3, %v1074_v1  ;;  %v1092_v9 = vcombine.high %v1058_v3, %v1074_v1 }
 0x359   : > { %v1083_v10 = vrot.slane %v1075_v5, %v3276_v62  ;;  %v1090_v11 = vrot.slane %v1076_v6, %v3276_v62  ;;  %v1099_v12 = vrot.slane %v1091_v7, %v3276_v62  ;;  %v1106_v13 = vrot.slane %v1092_v9, %v3276_v62 }
 0x35a   : > { %v888_v14 = vpop.permute.xlu1 %887 }
 0x35b   : > { %v1111_v15 = vcombine.low %v1083_v10, %v1090_v11  ;;  %v2369_v16 = vcombine.high %v1083_v10, %v1090_v11  ;;  %v1127_v17 = vcombine.low %v1099_v12, %v1106_v13  ;;  %v2370_v18 = vcombine.high %v1099_v12, %v1106_v13 }
 0x35c   : > { %v893_v19 = vcombine.low %v882_v42, %v888_v14  ;;  %v894_v20 = vcombine.high %v882_v42, %v888_v14 }
 0x35d   : > { %v1118_v21 = vrot.slane %v1111_v15, %v3274_v56  ;;  %v1126_v22 = vrot.slane %v2369_v16, %v3274_v56  ;;  %v1134_v23 = vrot.slane %v1127_v17, %v3274_v56  ;;  %v1142_v24 = vrot.slane %v2370_v18, %v3274_v56 }
 0x35e   : > { %v891_v25 = vpop.permute.xlu1 %890  ;;  %v901_v30 = vrot.slane %v893_v19, %v3274_v56  ;;  %v908_v31 = vrot.slane %v894_v20, %v3274_v56 }
 0x35f   : > { %v909_v26 = vcombine.low %v885_v4, %v891_v25  ;;  %v910_v27 = vcombine.high %v885_v4, %v891_v25  ;;  %v1143_v28 = vcombine.low %v1118_v21, %v1126_v22  ;;  %v1159_v29 = vcombine.low %v1134_v23, %v1142_v24  ;;  %v2373_v25 = vld [vmem:[%s647_s20] ss:$0 sm:$0xff] }
 0x360   : > { %v1144_v36 = vcombine.high %v1118_v21, %v1126_v22  ;;  %v1160_v37 = vcombine.high %v1134_v23, %v1142_v24 }
 0x361   : > { %v917_v32 = vrot.slane %v909_v26, %v3274_v56  ;;  %v924_v33 = vrot.slane %v910_v27, %v3274_v56  ;;  %v1151_v34 = vrot.slane %v1143_v28, %v3276_v62  ;;  %v1167_v35 = vrot.slane %v1159_v29, %v3276_v62 }
 0x362   : > { %v1158_v51 = vrot.slane %v1144_v36, %v3276_v62  ;;  %v1174_v52 = vrot.slane %v1160_v37, %v3276_v62 }
 0x363   : > { %v925_v38 = vcombine.low %v901_v30, %v917_v32  ;;  %v926_v39 = vcombine.high %v901_v30, %v917_v32  ;;  %v941_v40 = vcombine.low %v908_v31, %v924_v33  ;;  %v942_v42 = vcombine.high %v908_v31, %v924_v33 }
 0x364   : > { %v1175_v43 = vcombine.low %v1151_v34, %v1167_v35  ;;  %v1176_v44 = vcombine.high %v1151_v34, %v1167_v35  ;;  %v1177_v4 = vcombine.low %v1158_v51, %v1174_v52  ;;  %v1178_v5 = vcombine.high %v1158_v51, %v1174_v52  ;;  %v2363_v51 = vld [vmem:[#allocation10] ss:$0 sm:$0xff] }
 0x365   : > { %v933_v45 = vrot.slane %v925_v38, %v3276_v62  ;;  %v940_v46 = vrot.slane %v926_v39, %v3276_v62  ;;  %v949_v47 = vrot.slane %v941_v40, %v3276_v62  ;;  %v956_v48 = vrot.slane %v942_v42, %v3276_v62 }
 0x366   : > { %v1179_v49 = vpack.c.bf16 %v1175_v43, %v1175_v43  ;;  %v1180_v50 = vpack.c.bf16 %v1176_v44, %v1176_v44  ;;  %v1181_v13 = vpack.c.bf16 %v1177_v4, %v1177_v4  ;;  %v1182_v14 = vpack.c.bf16 %v1178_v5, %v1178_v5 }
 0x367   : > { %v961_v53 = vcombine.low %v933_v45, %v940_v46  ;;  %v2367_v54 = vcombine.high %v933_v45, %v940_v46  ;;  %v977_v55 = vcombine.low %v949_v47, %v956_v48  ;;  %v2368_v57 = vcombine.high %v949_v47, %v956_v48 }
 0x368   : > { %v1345_v58 = vsel %vm1340_vm4, %v1179_v49, 0  ;;  %v1391_v59 = vsel %vm1340_vm4, %v1180_v50, 0  ;;  %v1437_v19 = vsel %vm1340_vm4, %v1181_v13, 0  ;;  %v1483_v20 = vsel %vm1340_vm4, %v1182_v14, 0 }
 0x369   : > { %v968_v60 = vrot.slane %v961_v53, %v3274_v56  ;;  %v976_v61 = vrot.slane %v2367_v54, %v3274_v56  ;;  %v984_v63 = vrot.slane %v977_v55, %v3274_v56  ;;  %v992_v1 = vrot.slane %v2368_v57, %v3274_v56  ;;  %2472 = vmatpush3.bf16.xpose.msra.mxu1 %v1345_v58 }
 0x36a   : > { %2478 = vmatpush3.bf16.xpose.msra.mxu0 %v1391_v59  ;;  %2483 = vmatprep.subr.bf16.mxu1 %v2920_v8  ;;  %v877_v52 = vadd.f32 %v2363_v51, %v3269_v41 }
 0x36b   : > { %2489 = vmatprep.subr.bf16.mxu0 %v2920_v8  ;;  %v993_v2 = vcombine.low %v968_v60, %v976_v61  ;;  %v1009_v3 = vcombine.low %v984_v63, %v992_v1  ;;  %v994_v6 = vcombine.high %v968_v60, %v976_v61  ;;  %v1010_v7 = vcombine.high %v984_v63, %v992_v1 }
 0x36d   : > { %v1001_v9 = vrot.slane %v993_v2, %v3276_v62  ;;  %v1017_v10 = vrot.slane %v1009_v3, %v3276_v62  ;;  %v1008_v17 = vrot.slane %v994_v6, %v3276_v62  ;;  %v1024_v18 = vrot.slane %v1010_v7, %v3276_v62 }
 0x36f   : > { %v1025_v11 = vcombine.low %v1001_v9, %v1017_v10  ;;  %v1026_v12 = vcombine.high %v1001_v9, %v1017_v10  ;;  %v1027_v21 = vcombine.low %v1008_v17, %v1024_v18  ;;  %v1028_v22 = vcombine.high %v1008_v17, %v1024_v18 }
 0x371   : > { %v1029_v15 = vpack.c.bf16 %v1025_v11, %v1025_v11  ;;  %v1030_v16 = vpack.c.bf16 %v1026_v12, %v1026_v12  ;;  %v1031_v23 = vpack.c.bf16 %v1027_v21, %v1027_v21  ;;  %v1032_v24 = vpack.c.bf16 %v1028_v22, %v1028_v22 }
 0x373   : > { %2474 = vmatmul.mubr.msk.bf16.vlgmr.msra.gmra.mrb[0].mxu1 %vm1340_vm4, %v1029_v15  ;;  %2480 = vmatmul.mubr.msk.bf16.vlgmr.msra.gmra.mrb[12].mxu0 %vm1340_vm4, %v1030_v16 }
 0x374   : > { %2484 = vmatpush3.bf16.xpose.msra.mxu1 %v1437_v19  ;;  %2490 = vmatpush3.bf16.xpose.msra.mxu0 %v1483_v20 }
 0x375   : > { %2485 = vmatprep.mubr.msk.bf16.mxu1 %vm2921_vm1, %v2920_v8  ;;  %2491 = vmatprep.mubr.msk.bf16.mxu0 %vm2921_vm1, %v2920_v8 }
 0x376   : > { %2495 = vmatprep.subr.bf16.mxu1 %v2920_v8  ;;  %2501 = vmatprep.subr.bf16.mxu0 %v2920_v8 }
 0x37b   : > { %2486 = vmatmul.mubr.msk.bf16.vlgmr.msra.gmra.mrb[4].mxu1 %vm1340_vm4, %v1031_v23  ;;  %2492 = vmatmul.mubr.msk.bf16.vlgmr.msra.gmra.mrb[16].mxu0 %vm1340_vm4, %v1032_v24 }
 0x37c   : > { %2497 = vmatprep.mubr.msk.bf16.mxu1 %vm2921_vm1, %v2920_v8  ;;  %2503 = vmatprep.mubr.msk.bf16.mxu0 %vm2921_vm1, %v2920_v8 }
 0x446   : > { %v1381_v26 = vpop.f32.mrb[0].mxu1  ;;  %v1427_v27 = vpop.f32.mrb[12].mxu0 }
 0x447   : > { %v1382_v28 = vadd.f32 %v2373_v25, %v1381_v26  ;;  %v1428_v29 = vadd.f32 %v2373_v25, %v1427_v27  ;;  %v2475_v30 = vpop.f32.mrb[1].mxu1  ;;  %v2481_v31 = vpop.f32.mrb[13].mxu0 }
 0x448   : > { %v1384_v32 = vpop.f32.mrb[2].mxu1  ;;  %v1430_v33 = vpop.f32.mrb[14].mxu0 }
 0x449   : > { %v2476_v34 = vpop.f32.mrb[3].mxu1  ;;  %v2482_v35 = vpop.f32.mrb[15].mxu0  ;;  %v1525_v36 = vsel %vm1340_vm4, %v1382_v28, -inf  ;;  %v1528_v37 = vsel %vm1340_vm4, %v1428_v29, -inf }
 0x44a   : > { %1526 = vmax.xlane.f32.xlu1 %v1525_v36  ;;  %1529 = vmax.xlane.f32.xlu0 %v1528_v37 }
 0x44e   : > { %v1473_v38 = vpop.f32.mrb[4].mxu1  ;;  %v1519_v39 = vpop.f32.mrb[16].mxu0 }
 0x44f   : > { %v1474_v40 = vadd.f32 %v2373_v25, %v1473_v38  ;;  %v2487_v42 = vpop.f32.mrb[5].mxu1  ;;  %v2493_v43 = vpop.f32.mrb[17].mxu0  ;;  %v1520_v46 = vadd.f32 %v2373_v25, %v1519_v39 }
 0x450   : > { %v1476_v44 = vpop.f32.mrb[6].mxu1  ;;  %v1522_v45 = vpop.f32.mrb[18].mxu0 }
 0x451   : > { %v2488_v47 = vpop.f32.mrb[7].mxu1  ;;  %v2494_v48 = vpop.f32.mrb[19].mxu0  ;;  %v1531_v49 = vsel %vm1340_vm4, %v1474_v40, -inf  ;;  %v1534_v50 = vsel %vm1340_vm4, %v1520_v46, -inf }
 0x452   : > { %1532 = vmax.xlane.f32.xlu1 %v1531_v49 }
 0x456   : > { %1535 = vmax.xlane.f32.xlu1 %v1534_v50 }
 0x467   : > { %1187 = vrot.lane.b32.xlu1 %v877_v52, %s2924_s7 }
 0x4d7   : > { %v1527_v53 = vpop.xlane.xlu1 %1526  ;;  %v1530_v54 = vpop.xlane.xlu0 %1529 }
 0x4d8   : > { %v1537_v55 = vsub.f32 %v1382_v28, %v1527_v53  ;;  %v1538_v57 = vsub.f32 %v1428_v29, %v1530_v54 }
 0x4da   : > { %v1541_v58 = vmul.f32 1.442695, %v1537_v55  ;;  %v1543_v59 = vmul.f32 1.442695, %v1538_v57 }
 0x4dc   : > { %2677 = vpow2.f32 %v1541_v58 }
 0x4dd   : > { %2679 = vpow2.f32 %v1543_v59 }
 0x4df   : > { %v1533_v1 = vpop.xlane.xlu1 %1532 }
 0x4e0   : > { %v1539_v3 = vsub.f32 %v1474_v40, %v1533_v1 }
 0x4e2   : > { %v1545_v5 = vmul.f32 1.442695, %v1539_v3 }
 0x4e3   : > { %v1536_v2 = vpop.xlane.xlu1 %1535 }
 0x4e4   : > { %v1540_v4 = vsub.f32 %v1520_v46, %v1536_v2  ;;  %2681 = vpow2.f32 %v1545_v5 }
 0x4e6   : > { %v3340_v60 = vpop.eup %2677  ;;  %v1547_v6 = vmul.f32 1.442695, %v1540_v4 }
 0x4e7   : > { %v3342_v61 = vpop.eup %2679  ;;  %v1549_v63 = vsel %vm1340_vm4, %v3340_v60, 0.0  ;;  %v1188_v12 = vpop.permute.xlu1 %1187 }
 0x4e8   : > { %1550 = vadd.xlane.f32.xlu0 %v1549_v63  ;;  %v1552_v41 = vsel %vm1340_vm4, %v3342_v61, 0.0  ;;  %2683 = vpow2.f32 %v1547_v6  ;;  %v1193_v15 = vcombine.low %v877_v52, %v1188_v12  ;;  %v1194_v16 = vcombine.high %v877_v52, %v1188_v12 }
 0x4e9   : > { %1553 = vadd.xlane.f32.xlu1 %v1552_v41 }
 0x4ea   : > { %v1201_v21 = vrot.slane %v1193_v15, %v3274_v56  ;;  %v1208_v22 = vrot.slane %v1194_v16, %v3274_v56 }
 0x4ee   : > { %v3350_v7 = vpop.eup %2681 }
 0x4ef   : > { %v1555_v10 = vsel %vm1340_vm4, %v3350_v7, 0.0 }
 0x4f2   : > { %v3352_v9 = vpop.eup %2683 }
 0x4f3   : > { %v1558_v11 = vsel %vm1340_vm4, %v3352_v9, 0.0 }
 0x4fa   : > { %1190 = vrot.lane.b32.xlu1 %v877_v52, %s2922_s27  ;;  %s2404_s27 = sshll.u32 %s3047_s0, 7  ;;  %s2206_s0 = scalar_lea.sflag [#allocation4], %s638_s29 }
 0x4fb   : > { %s3493_s20 = scalar_lea.hbm %s3601_s17, %s2404_s27 }
 0x4fe   : > { %1184 = vrot.lane.b32.xlu0 %v877_v52, %s2923_s18 }
 0x51d   : > { %1556 = vadd.xlane.f32.xlu0 %v1555_v10 }
 0x51e   : > { %1559 = vadd.xlane.f32.xlu1 %v1558_v11 }
 0x575   : > { %v1551_v13 = vpop.xlane.xlu0 %1550 }
 0x576   : > { %v1554_v14 = vpop.xlane.xlu1 %1553  ;;  %2685 = vrcp.f32 %v1551_v13 }
 0x577   : > { %2687 = vrcp.f32 %v1554_v14 }
 0x579   : > { %v1185_v17 = vpop.permute.xlu0 %1184 }
 0x57a   : > { %v1191_v18 = vpop.permute.xlu1 %1190 }
 0x57b   : > { %v1209_v19 = vcombine.low %v1185_v17, %v1191_v18  ;;  %v1210_v20 = vcombine.high %v1185_v17, %v1191_v18  ;;  %v2661_v17 = vld [vmem:[%s3546_s10] sm:$0xff]  }
 0x57d   : > { %v1217_v23 = vrot.slane %v1209_v19, %v3274_v56  ;;  %v1224_v24 = vrot.slane %v1210_v20, %v3274_v56 }
 0x57f   : > { %v1225_v25 = vcombine.low %v1201_v21, %v1217_v23  ;;  %v1226_v26 = vcombine.high %v1201_v21, %v1217_v23  ;;  %v1241_v27 = vcombine.low %v1208_v22, %v1224_v24  ;;  %v1242_v28 = vcombine.high %v1208_v22, %v1224_v24 }
 0x580   : > { %v2686_v48 = vpop.eup %2685 }
 0x581   : > { %v1233_v29 = vrot.slane %v1225_v25, %v3276_v62  ;;  %v1240_v30 = vrot.slane %v1226_v26, %v3276_v62  ;;  %v1249_v31 = vrot.slane %v1241_v27, %v3276_v62  ;;  %v1256_v32 = vrot.slane %v1242_v28, %v3276_v62  ;;  %v2688_v51 = vpop.eup %2687 }
 0x582   : > { %v1565_v57 = vmul.f32 %v2686_v48, %v3340_v60  ;;  %v1566_v58 = vmul.f32 %v2688_v51, %v3342_v61 }
 0x583   : > { %v1261_v33 = vcombine.low %v1233_v29, %v1240_v30  ;;  %v2371_v34 = vcombine.high %v1233_v29, %v1240_v30  ;;  %v1277_v35 = vcombine.low %v1249_v31, %v1256_v32  ;;  %v2372_v36 = vcombine.high %v1249_v31, %v1256_v32 }
 0x584   : > { %v1569_v4 = vpack.c.bf16 %v1565_v57, %v1565_v57  ;;  %v1570_v5 = vpack.c.bf16 %v1566_v58, %v1566_v58 }
 0x585   : > { %v1268_v37 = vrot.slane %v1261_v33, %v3274_v56  ;;  %v1276_v38 = vrot.slane %v2371_v34, %v3274_v56  ;;  %v1284_v39 = vrot.slane %v1277_v35, %v3274_v56  ;;  %v1292_v40 = vrot.slane %v2372_v36, %v3274_v56 }
 0x587   : > { %v1293_v42 = vcombine.low %v1268_v37, %v1276_v38  ;;  %v1294_v43 = vcombine.high %v1268_v37, %v1276_v38  ;;  %v1309_v44 = vcombine.low %v1284_v39, %v1292_v40  ;;  %v1310_v45 = vcombine.high %v1284_v39, %v1292_v40 }
 0x589   : > { %v1301_v46 = vrot.slane %v1293_v42, %v3276_v62  ;;  %v1308_v47 = vrot.slane %v1294_v43, %v3276_v62  ;;  %v1317_v49 = vrot.slane %v1309_v44, %v3276_v62  ;;  %v1324_v50 = vrot.slane %v1310_v45, %v3276_v62  ;;  %v2662_v45 = vld [vmem:[%s3546_s10 + $0x8] sm:$0xff]  }
 0x58b   : > { %v1325_v52 = vcombine.low %v1301_v46, %v1317_v49  ;;  %v1326_v53 = vcombine.high %v1301_v46, %v1317_v49  ;;  %v1327_v54 = vcombine.low %v1308_v47, %v1324_v50  ;;  %v1328_v55 = vcombine.high %v1308_v47, %v1324_v50 }
 0x58d   : > { %v1329_v59 = vpack.c.bf16 %v1325_v52, %v1325_v52  ;;  %v1330_v63 = vpack.c.bf16 %v1326_v53, %v1326_v53  ;;  %v1331_v2 = vpack.c.bf16 %v1327_v54, %v1327_v54  ;;  %v1332_v3 = vpack.c.bf16 %v1328_v55, %v1328_v55 }
 0x58f   : > { %v1578_v41 = vsel %vm1576_vm5, %v1329_v59, 0  ;;  %v1624_v1 = vsel %vm1576_vm5, %v1330_v63, 0  ;;  %v1670_v60 = vsel %vm1576_vm5, %v1331_v2, 0  ;;  %v1716_v61 = vsel %vm1576_vm5, %v1332_v3, 0 }
 0x590   : > { %2496 = vmatpush3.bf16.msra.mxu1 %v1578_v41  ;;  %2502 = vmatpush3.bf16.msra.mxu0 %v1624_v1 }
 0x591   : > { %2507 = vmatprep.subr.bf16.mxu1 %v2920_v8  ;;  %2513 = vmatprep.subr.bf16.mxu0 %v2920_v8 }
 0x593   : > { %2498 = vmatmul.mubr.msk.bf16.vlgmr.msra.gmra.mrb[8].mxu1 %vm1340_vm4, %v1569_v4  ;;  %2504 = vmatmul.mubr.msk.bf16.vlgmr.msra.gmra.mrb[20].mxu0 %vm1340_vm4, %v1570_v5 }
 0x594   : > { %2508 = vmatpush3.bf16.msra.mxu1 %v1670_v60  ;;  %2514 = vmatpush3.bf16.msra.mxu0 %v1716_v61 }
 0x595   : > { %2509 = vmatprep.mubr.msk.bf16.mxu1 %vm2921_vm1, %v2920_v8  ;;  %2515 = vmatprep.mubr.msk.bf16.mxu0 %vm2921_vm1, %v2920_v8 }
 0x596   : > { %2519 = vmatprep.subr.bf16.mxu1 %v2920_v8  ;;  %2527 = vmatprep.subr.bf16.mxu0 %v2920_v8 }
 0x5aa   : > { %v1557_v6 = vpop.xlane.xlu0 %1556 }
 0x5ab   : > { %2689 = vrcp.f32 %v1557_v6  ;;  %v1560_v10 = vpop.xlane.xlu1 %1559 }
 0x5ac   : > { %2691 = vrcp.f32 %v1560_v10 }
 0x5b5   : > { %v2690_v11 = vpop.eup %2689 }
 0x5b6   : > { %v2692_v12 = vpop.eup %2691  ;;  %v1567_v13 = vmul.f32 %v2690_v11, %v3350_v7 }
 0x5b7   : > { %v1568_v14 = vmul.f32 %v2692_v12, %v3352_v9 }
 0x5b8   : > { %v1571_v15 = vpack.c.bf16 %v1567_v13, %v1567_v13 }
 0x5b9   : > { %v1572_v16 = vpack.c.bf16 %v1568_v14, %v1568_v14 }
 0x5ba   : > { %2510 = vmatmul.mubr.msk.bf16.vlgmr.msra.gmra.mrb[12].mxu1 %vm1340_vm4, %v1571_v15 }
 0x5bb   : > { %2516 = vmatmul.mubr.msk.bf16.vlgmr.msra.gmra.mrb[24].mxu0 %vm1340_vm4, %v1572_v16  ;;  %2523 = vmatprep.mubr.msk.bf16.mxu1 %vm2921_vm1, %v2920_v8  ;;  %v2384_v16 = vld [vmem:[%s3547_s11] ss:$0 sm:$0xff] }
 0x5bc   : > { %2531 = vmatprep.mubr.msk.bf16.mxu0 %vm2921_vm1, %v2920_v8  ;;  %2520 = vmatpush3.bf16.msra.mxu1 %v2661_v17 }
 0x5bd   : > { %2521 = vmatprep.subr.bf16.mxu1 %v2920_v8 }
 0x5c0   : > { %2522 = vmatpush3.bf16.msra.mxu1 %v2662_v45  ;;  %v2666_v45 = vld [vmem:[%s3552_s16 + $0x8] sm:$0xff]  }
 0x5c1   : > { %2535 = vmatprep.subr.bf16.mxu1 %v2920_v8 }
 0x666   : > { %v1614_v7 = vpop.f32.mrb[8].mxu1  ;;  %v1660_v9 = vpop.f32.mrb[20].mxu0 }
 0x667   : > { %v2499_v18 = vpop.f32.mrb[9].mxu1  ;;  %v2505_v19 = vpop.f32.mrb[21].mxu0 }
 0x668   : > { %v1617_v20 = vpop.f32.mrb[10].mxu1  ;;  %v1663_v21 = vpop.f32.mrb[22].mxu0 }
 0x669   : > { %v2500_v22 = vpop.f32.mrb[11].mxu1  ;;  %v2506_v23 = vpop.f32.mrb[23].mxu0 }
 0x68d   : > { %v1706_v24 = vpop.f32.mrb[12].mxu1 }
 0x68e   : > { %v1758_v25 = vcombine.low %v1614_v7, %v1706_v24  ;;  %v1759_v26 = vcombine.high %v1614_v7, %v1706_v24  ;;  %v1752_v27 = vpop.f32.mrb[24].mxu0  ;;  %v2511_v28 = vpop.f32.mrb[13].mxu1 }
 0x68f   : > { %v1774_v29 = vcombine.low %v1660_v9, %v1752_v27  ;;  %v1775_v30 = vcombine.high %v1660_v9, %v1752_v27  ;;  %v2517_v31 = vpop.f32.mrb[25].mxu0  ;;  %v1709_v32 = vpop.f32.mrb[14].mxu1  ;;  %v2663_v27 = vld [vmem:[%s3550_s14] sm:$0xff]  }
 0x690   : > { %v1766_v33 = vrot.slane %v1758_v25, %v3274_v56  ;;  %v1773_v34 = vrot.slane %v1759_v26, %v3274_v56  ;;  %v1755_v35 = vpop.f32.mrb[26].mxu0  ;;  %v2512_v36 = vpop.f32.mrb[15].mxu1  ;;  %2528 = vmatpush3.bf16.msra.mxu0 %v2663_v27  ;;  %v2665_v28 = vld [vmem:[%s3552_s16] sm:$0xff]  }
 0x691   : > { %v1782_v37 = vrot.slane %v1774_v29, %v3274_v56  ;;  %v1789_v38 = vrot.slane %v1775_v30, %v3274_v56  ;;  %v2518_v39 = vpop.f32.mrb[27].mxu0  ;;  %2529 = vmatprep.subr.bf16.mxu0 %v2920_v8 }
 0x693   : > { %v1790_v40 = vcombine.low %v1766_v33, %v1782_v37  ;;  %v1791_v42 = vcombine.high %v1766_v33, %v1782_v37  ;;  %v1806_v43 = vcombine.low %v1773_v34, %v1789_v38  ;;  %v1807_v44 = vcombine.high %v1773_v34, %v1789_v38  ;;  %v2388_v37 = vld [vmem:[%s3548_s12] ss:$0 sm:$0xff] }
 0x695   : > { %v1798_v46 = vrot.slane %v1790_v40, %v3276_v62  ;;  %v1805_v47 = vrot.slane %v1791_v42, %v3276_v62  ;;  %v1814_v48 = vrot.slane %v1806_v43, %v3276_v62  ;;  %v1821_v49 = vrot.slane %v1807_v44, %v3276_v62  ;;  %v2389_v40 = vld [vmem:[%s3549_s13] ss:$0 sm:$0xff] }
 0x697   : > { %v1826_v50 = vcombine.low %v1798_v46, %v1805_v47  ;;  %v2382_v51 = vcombine.high %v1798_v46, %v1805_v47  ;;  %v1842_v52 = vcombine.low %v1814_v48, %v1821_v49  ;;  %v2383_v53 = vcombine.high %v1814_v48, %v1821_v49  ;;  %v2667_v46 = vld [vmem:[%s3552_s16 + $0x10] sm:$0xff]   ;;  %v2668_v47 = vld [vmem:[%s3552_s16 + $0x18] sm:$0xff]   ;;  %v2669_v48 = vld [vmem:[%s3552_s16 + $0x20] sm:$0xff]  }
 0x698   : > { %v2670_v49 = vld [vmem:[%s3552_s16 + $0x28] sm:$0xff]  }
 0x699   : > { %v1833_v54 = vrot.slane %v1826_v50, %v3274_v56  ;;  %v1841_v55 = vrot.slane %v2382_v51, %v3274_v56  ;;  %v1849_v57 = vrot.slane %v1842_v52, %v3274_v56  ;;  %v1857_v58 = vrot.slane %v2383_v53, %v3274_v56  ;;  %v2671_v50 = vld [vmem:[%s3552_s16 + $0x30] sm:$0xff]   ;;  %v2672_v51 = vld [vmem:[%s3552_s16 + $0x38] sm:$0xff]   ;;  %v2390_v52 = vld [vmem:[%s3551_s15] ss:$0 sm:$0xff] }
 0x69b   : > { %v1859_v59 = vcombine.high %v1833_v54, %v1841_v55  ;;  %v1875_v63 = vcombine.high %v1849_v57, %v1857_v58  ;;  %v1858_v41 = vcombine.low %v1833_v54, %v1841_v55  ;;  %v1874_v1 = vcombine.low %v1849_v57, %v1857_v58 }
 0x69d   : > { %v1873_v2 = vrot.slane %v1859_v59, %v3276_v62  ;;  %v1889_v3 = vrot.slane %v1875_v63, %v3276_v62  ;;  %v1866_v4 = vrot.slane %v1858_v41, %v3276_v62  ;;  %v1882_v5 = vrot.slane %v1874_v1, %v3276_v62 }
 0x69f   : > { %v1892_v60 = vcombine.low %v1873_v2, %v1889_v3  ;;  %v1891_v61 = vcombine.high %v1866_v4, %v1882_v5  ;;  %v1893_v6 = vcombine.high %v1873_v2, %v1889_v3  ;;  %v1890_v10 = vcombine.low %v1866_v4, %v1882_v5 }
 0x6a1   : > { %1899 = vrot.lane.b32.xlu1 %v1892_v60, %s2927_s22  ;;  %1895 = vrot.lane.b32.xlu0 %v1891_v61, %s2928_s23  ;;  %s2351_s22 = sshll.u32 %s638_s29, 3  ;;  %v2394_v61 = vld [vmem:[%s3599_s21] ss:$0 sm:$0xff] }
 0x6a2   : > { %s640_s18 = scalar_lea.vmem [#allocation11], %s2351_s22  ;;  %s2845_s22 = scalar_lea.vmem %s2844_s30, 256 }
 0x6a3   : > { %s2219_s7 = sshll.u32 %s640_s18, 4  ;;  %s3495_s7 = int_to_ptr.vmem [resolvable:$true] %s2219_s7 }
 0x6a4   : > { %s2839_s24 = scalar_lea.vmem %s3495_s7, 128  ;;  %p2846_p8 = scmp.lt.s32.totalorder %s3495_s7, %s2844_s30 }
 0x6a5   : > { %1903 = vrot.lane.b32.xlu0 %v1893_v6, %s2929_s3  ;;  %p2840_p2 = scmp.ne.s32.totalorder %s3495_s7, %s2839_s24  ;;  %p2847_p11 = scmp.lt.s32.totalorder %s2845_s22, %s2839_s24 }
 0x6a7   : > { %p2841_p4 = pnand %p2840_p2, %p3602_p3  ;;  %p2848_p13 = por %p2847_p11, %p2846_p8 }
 0x6a9   : > { %p2842_p7 = pneg %p2841_p4 }
 0x6ab   : > { %p2849_p1 = pnand %p2848_p13, %p2842_p7 }
 0x713   : > { %v1896_v56 = vpop.permute.xlu0 %1895  ;;  %v1900_v11 = vpop.permute.xlu1 %1899 }
 0x714   : > { %v1906_v12 = vsel %vm1340_vm4, %v1890_v10, %v1896_v56 }
 0x715   : > { %v1908_v14 = vsel %vm1907_vm6, %v1906_v12, %v1900_v11 }
 0x717   : > { %v1904_v13 = vpop.permute.xlu0 %1903 }
 0x718   : > { %v1910_v15 = vsel %vm1909_vm7, %v1908_v14, %v1904_v13 }
 0x719   : > { %v1911_v62 = vpack.c.bf16 %v1910_v15, %v1910_v15 }
 0x71b   : > { %2524 = vmatmul.mubr.msk.bf16.vlgmr.msra.gmra.mrb[16].mxu1 %vm652_vm0, %v1911_v62 }
 0x71c   : > { %2551 = vmatprep.mubr.msk.bf16.mxu1 %vm2921_vm1, %v2920_v8  ;;  %2536 = vmatpush3.bf16.msra.mxu1 %v2665_v28 }
 0x71d   : > { %2537 = vmatprep.subr.bf16.mxu1 %v2920_v8 }
 0x720   : > { %2538 = vmatpush3.bf16.msra.mxu1 %v2666_v45 }
 0x721   : > { %2539 = vmatprep.subr.bf16.mxu1 %v2920_v8 }
 0x724   : > { %2540 = vmatpush3.bf16.msra.mxu1 %v2667_v46 }
 0x725   : > { %2541 = vmatprep.subr.bf16.mxu1 %v2920_v8 }
 0x728   : > { %2542 = vmatpush3.bf16.msra.mxu1 %v2668_v47 }
 0x729   : > { %2543 = vmatprep.subr.bf16.mxu1 %v2920_v8 }
 0x72c   : > { %2544 = vmatpush3.bf16.msra.mxu1 %v2669_v48 }
 0x72d   : > { %2545 = vmatprep.subr.bf16.mxu1 %v2920_v8 }
 0x730   : > { %2546 = vmatpush3.bf16.msra.mxu1 %v2670_v49 }
 0x731   : > { %2547 = vmatprep.subr.bf16.mxu1 %v2920_v8 }
 0x734   : > { %2548 = vmatpush3.bf16.msra.mxu1 %v2671_v50 }
 0x735   : > { %2549 = vmatprep.subr.bf16.mxu1 %v2920_v8 }
 0x738   : > { %2550 = vmatpush3.bf16.msra.mxu1 %v2672_v51 }
 0x7ee   : > { %v1972_v17 = vpop.f32.mrb[16].mxu1 }
 0x7ef   : > { %v1973_v7 = vadd.f32 %v2384_v16, %v1972_v17  ;;  %v2525_v9 = vpop.f32.mrb[17].mxu1 }
 0x7f0   : > { %v1975_v18 = vpop.f32.mrb[18].mxu1 }
 0x7f1   : > { %v3430_v19 = vadd.f32 %v1973_v7, %v3221_v0  ;;  %v2526_v20 = vpop.f32.mrb[19].mxu1  ;;  %v2664_v0 = vld [vmem:[%s3550_s14 + $0x8] sm:$0xff]  }
 0x7f2   : > { %2530 = vmatpush3.bf16.msra.mxu0 %v2664_v0 }
 0x7f3   : > { %v1981_v21 = vsel %vm652_vm0, %v3430_v19, 0.0 }
 0x7f4   : > { %1982 = vadd.xlane.f32.xlu1 %v1981_v21 }
 0x881   : > { %v1983_v22 = vpop.xlane.xlu1 %1982 }
 0x882   : > { %v1984_v23 = vmul.f32 0.03125, %v1983_v22 }
 0x884   : > { %v1985_v24 = vsub.f32 %v3430_v19, %v1984_v23 }
 0x886   : > { %v1986_v25 = vmul.f32 %v1985_v24, %v1985_v24  ;;  %v2004_v38 = vmul.f32 %v2388_v37, %v1985_v24 }
 0x888   : > { %v1987_v26 = vsel %vm652_vm0, %v1986_v25, 0.0 }
 0x889   : > { %1988 = vadd.xlane.f32.xlu0 %v1987_v26 }
 0x916   : > { %v1989_v29 = vpop.xlane.xlu0 %1988 }
 0x917   : > { %v1990_v30 = vmul.f32 0.032258064, %v1989_v29 }
 0x919   : > { %2693 = vrsqrt.f32 %v1990_v30  ;;  %vm1993_vm8 = vcmp.eq.f32.partialorder %v1990_v30, inf  ;;  %v1996_v33 = vand.u32 2147483648, %v1990_v30  ;;  %vm1995_vm9 = vcmp.eq.f32.partialorder %v1990_v30, 0.0 }
 0x923   : > { %v2694_v31 = vpop.eup %2693 }
 0x924   : > { %v1992_v32 = vmul.f32 %v2694_v31, %v1990_v30 }
 0x926   : > { %v1994_v34 = vsel %vm1993_vm8, %v1990_v30, %v1992_v32 }
 0x927   : > { %v1997_v35 = vsel %vm1995_vm9, %v1996_v33, %v1994_v34 }
 0x928   : > { %v2005_v36 = vadd.f32 1e-06, %v1997_v35 }
 0x92a   : > { %2695 = vrcp.f32 %v2005_v36 }
 0x934   : > { %v2696_v39 = vpop.eup %2695 }
 0x935   : > { %v2007_v42 = vmul.f32 %v2696_v39, %v2004_v38 }
 0x937   : > { %v2014_v43 = vadd.f32 %v2389_v40, %v2007_v42 }
 0x939   : > { %v2015_v44 = vpack.c.bf16 %v2014_v43, %v2014_v43 }
 0x93b   : > { %2532 = vmatmul.mubr.msk.bf16.vlgmr.msra.gmra.mrb[28].mxu0 %vm652_vm0, %v2015_v44 }
 0xa0e   : > { %v2076_v53 = vpop.f32.mrb[28].mxu0 }
 0xa0f   : > { %v2077_v54 = vadd.f32 %v2390_v52, %v2076_v53  ;;  %v2533_v55 = vpop.f32.mrb[29].mxu0 }
 0xa10   : > { %v2079_v57 = vpop.f32.mrb[30].mxu0 }
 0xa11   : > { %v2083_v58 = vmul.f32 0.044715, %v2077_v54  ;;  %v2534_v59 = vpop.f32.mrb[31].mxu0  ;;  %v2082_v8 = vmul.f32 0.5, %v2077_v54 }
 0xa13   : > { %v2084_v63 = vmul.f32 %v2083_v58, %v2077_v54 }
 0xa15   : > { %v2085_v41 = vmul.f32 %v2084_v63, %v2077_v54 }
 0xa17   : > { %v2086_v1 = vadd.f32 %v2085_v41, %v2077_v54 }
 0xa19   : > { %v2087_v2 = vmul.f32 0.7978846, %v2086_v1 }
 0xa1b   : > { %2697 = vtanh.f32 %v2087_v2 }
 0xa25   : > { %v2698_v3 = vpop.eup %2697 }
 0xa26   : > { %v2089_v4 = vadd.f32 1.0, %v2698_v3 }
 0xa28   : > { %v2090_v5 = vmul.f32 %v2089_v4, %v2082_v8 }
 0xa2a   : > { %v2091_v60 = vpack.c.bf16 %v2090_v5, %v2090_v5 }
 0xa2c   : > { %2552 = vmatmul.mubr.bf16.vlgmr.msra.gmra.mrb[20].mxu1 %v2091_v60 }
 0xaff   : > { %v2197_v6 = vpop.f32.mrb[20].mxu1 }
 0xb00   : > { %v2198_v10 = vadd.f32 %v2394_v61, %v2197_v6  ;;  %v2553_v56 = vpop.f32.mrb[21].mxu1 }
 0xb01   : > { %v2200_v11 = vpop.f32.mrb[22].mxu1 }
 0xb02   : > { %v2203_v12 = vadd.f32 %v2198_v10, %v3430_v19  ;;  %v2554_v13 = vpop.f32.mrb[23].mxu1 }
 0xb04   : > { %2204 = vst.msk [vmem:[%s640_s18] sm:$0xff] %vm652_vm0, %v2203_v12 }
 0xb05   : > { %2852 = shalt.err (!%p2849_p1)
}
 0xb06   : > { %s2853_s29 = scalar_lea.hbm %s3493_s20, 128  ;;  %s2857_s21 = scalar_lea.hbm %s3601_s17, 256 }
 0xb07   : > { %p2854_p0 = scmp.ne.s32.totalorder %s3493_s20, %s2853_s29  ;;  %p2858_p9 = scmp.lt.u32.totalorder %s3493_s20, %s3601_s17 }
 0xb08   : > { %p2859_p12 = scmp.lt.u32.totalorder %s2857_s21, %s2853_s29  ;;  %p2861_p2 = scmp.lt.u32.totalorder %s2853_s29, %s3493_s20 }
 0xb09   : > { %p2855_p6 = pnand %p2854_p0, %p3602_p3 }
 0xb0a   : > { %p2860_p10 = por %p2859_p12, %p2858_p9 }
 0xb0b   : > { %p2856_p5 = pneg %p2855_p6 }
 0xb0c   : > { %p2862_p4 = por %p2861_p2, %p2860_p10 }
 0xb0e   : > { %p2863_p7 = pnand %p2862_p4, %p2856_p5 }
 0xb10   : > { %2866 = shalt.err (!%p2863_p7)
}
 0xb11   : > { %2575 = dma.vmem_to_hbm [thread:$0]  (%p3602_p3), %s3495_s7, 128, %s3493_s20, %s2206_s0  }
 0xb12 PF: > { %s3603_s1 = sld [smem:[#allocation18_spill]]  ;;  %s3604_s26 = sld [smem:[#allocation16_spill]] }
 0xb13   : > { %s3605_s24 = sld [smem:[#allocation22_spill]] }
 0xb18   : > { %p2607_p8 = scmp.ge.s32.totalorder %s3603_s1, 2  ;;  %s2231_s2 = sand.u32 1, %s3604_s26  }
 0xb19   : > { %p3606_p11 = scmp.ne.s32.totalorder %s3605_s24, 0  ;;  %s2232_s30 = scalar_lea.sflag [#allocation4], %s2231_s2 }
 0xb1b   : > { %p2594_p13 = pnand %p2607_p8, %p3606_p11 }
 0xb1d   : > { %2896 = dma.done.wait (!%p2594_p13), %s2232_s30, 128  }
 0xb1e   : > { %2898 = vsyncadd (!%p2594_p13), %s2232_s30, 4294967168  ;;  %s3607_s30 = sld [smem:[#allocation19_spill]]  ;;  %s3608_s22 = sld [smem:[#allocation17_spill]] }
 0xb1f   : > { %s3609_s29 = sld [smem:[#allocation20_spill]]  ;;  %s3610_s27 = smov %s2905_s28 }
 0xb24   : > { %p31_p1 = scmp.ge.s32.totalorder %s3607_s30, 4   ;;  %s3611_s28 = smov %s3608_s22 }
 0xb26   :  { %33 = sbr.rel (!%p31_p1) target bundleno = 14 (0xe), region = 151 }
 0xb2d   :  { %2237 = vsyncpa [#allocation3], 1 }
 0xb2e   :  { %2239 = vsyncpa [#allocation3 + $0x1], 1 }
 0xb2f   :  { %2240 = vsyncpa [#allocation6], 1 }
 0xb30   :  { %2241 = vsyncpa [#allocation9], 1 }
 0xb31   :  { %2242 = vsyncpa [#allocation4], 1 }
 0xb32   :  { %2244 = vsyncpa [#allocation4 + $0x1], 1 }

</bundles_post_ra>
